<compile_context>
chip_gen: v6e
topology: v6e:2x2x1
jax: 0.10.0
libtpu: 0.0.40
codegen_flags: <defaults>
</compile_context>

<pallas_src>
import math
import functools

import jax
import jax.numpy as jnp
from jax.experimental import pallas as pl
from jax.experimental.pallas import tpu as pltpu


# Matmul-weight storage dtype.  Accumulation / softmax / LayerNorm are float32.
WEIGHT_DTYPE = jnp.bfloat16


# ----------------------------------------------------------------------------
# In-kernel helpers (only called inside Pallas kernels)
# ----------------------------------------------------------------------------
def _mm(a, w, b=None):
    """f32-accumulated matmul of an activation against a (bf16) weight array."""
    y = jnp.dot(a.astype(w.dtype), w, preferred_element_type=jnp.float32)
    if b is not None:
        y = y + b.astype(jnp.float32)
    return y


def _layernorm(z, w, b, eps):
    mu = jnp.mean(z, axis=-1, keepdims=True)
    var = jnp.mean(jnp.square(z - mu), axis=-1, keepdims=True)
    return (z - mu) * jax.lax.rsqrt(var + eps) * w + b


def _softmax_last(s):
    # Exact softmax (no approx reciprocal) to stay bit-faithful to the reference.
    s = s - jnp.max(s, axis=-1, keepdims=True)
    p = jnp.exp(s)
    return p / jnp.sum(p, axis=-1, keepdims=True)


# ----------------------------------------------------------------------------
# Fused decoder STACK kernel: grid = (batch_blocks, num_layers)
# ----------------------------------------------------------------------------
_STACK_ORDER = ('sa_qkv_w', 'sa_qkv_b', 'sa_out_w', 'sa_out_b', 'n1_w', 'n1_b',
                'ca_v_w', 'ca_v_b', 'ca_out_w', 'ca_out_b', 'n2_w', 'n2_b',
                'ff1_w', 'ff1_b', 'ff2_w', 'ff2_b', 'n3_w', 'n3_b')


def _decoder_stack_kernel(x_ref, mem_ref,
                          sa_qkv_w, sa_qkv_b, sa_out_w, sa_out_b, n1_w, n1_b,
                          ca_v_w, ca_v_b, ca_out_w, ca_out_b, n2_w, n2_b,
                          ff1_w, ff1_b, ff2_w, ff2_b, n3_w, n3_b,
                          o_ref, x_acc,
                          *, num_heads, bb, seq_len, eps):
    layer = pl.program_id(1)
    n_layers = pl.num_programs(1)
    S = seq_len
    H = x_ref.shape[-1]
    Dh = H // num_heads
    scale = 1.0 / math.sqrt(Dh)

    # First layer of each batch block: load the residual stream into the f32
    # VMEM carry.  It stays resident across the whole layer sweep.
    @pl.when(layer == 0)
    def _():
        x_acc[...] = x_ref[...].astype(jnp.float32)

    x = x_acc[...]                                          # (bb*S, H) f32

    # Causal target mask built in-kernel (no extra operand / DMA).
    row = jax.lax.broadcasted_iota(jnp.int32, (S, S), 0)
    col = jax.lax.broadcasted_iota(jnp.int32, (S, S), 1)
    causal = jnp.where(col <= row, 0.0, -1e9).astype(jnp.float32)

    # ----------------- self-attention (all heads batched) -----------------
    qkv = _mm(x, sa_qkv_w[0], sa_qkv_b[0])                  # (bb*S, 3H) f32
    w_out = sa_out_w[0]                                     # (nh, Dh, H) bf16
    attn_rows = []
    for b in range(bb):                                     # static, bb is tiny
        blk = qkv[b * S:(b + 1) * S]                        # (S, 3H)
        qh = jnp.stack([blk[:, h * Dh:(h + 1) * Dh] for h in range(num_heads)])
        kh = jnp.stack([blk[:, H + h * Dh:H + (h + 1) * Dh]
                        for h in range(num_heads)])
        vh = jnp.stack([blk[:, 2 * H + h * Dh:2 * H + (h + 1) * Dh]
                        for h in range(num_heads)])         # (nh, S, Dh)
        # One batched score matmul for all heads; the transpose of K is folded
        # into the dot_general (contract last dims) instead of an explicit .T.
        s = jnp.einsum('hqd,hkd->hqk', qh, kh,
                       preferred_element_type=jnp.float32) * scale + causal
        p = _softmax_last(s)                                # one softmax, all heads
        ctx = jnp.einsum('hqk,hkd->hqd', p, vh,
                         preferred_element_type=jnp.float32)      # (nh, S, Dh)
        # Fold the head-concat into the out-projection:
        #   concat_h(ctx_h) @ W_out  ==  sum_h ctx_h @ W_out[h]
        attn_b = jnp.einsum('hsd,hdo->hso', ctx.astype(w_out.dtype), w_out,
                            preferred_element_type=jnp.float32).sum(axis=0)
        attn_rows.append(attn_b)
    attn = attn_rows[0] if bb == 1 else jnp.concatenate(attn_rows, axis=0)
    attn = attn + sa_out_b[0].astype(jnp.float32)
    x = _layernorm(x + attn, n1_w[0], n1_b[0], eps)

    # ------------- cross-attention, specialized for memory length == 1 -------------
    # softmax over a single key is exactly 1 for every query, so the attention
    # output is just the V projection of the memory token, out-projected and
    # broadcast over the S target positions (bit-exact vs. the reference).
    mem = mem_ref[...][:, 0, :].astype(jnp.float32)         # (bb, H)
    ca = _mm(_mm(mem, ca_v_w[0], ca_v_b[0]), ca_out_w[0], ca_out_b[0])  # (bb, H)
    if bb == 1:
        ca_full = jnp.broadcast_to(ca, (S, H))
    else:
        ca_full = jnp.concatenate(
            [jnp.broadcast_to(ca[b:b + 1], (S, H)) for b in range(bb)], axis=0)
    x = _layernorm(x + ca_full, n2_w[0], n2_b[0], eps)

    # ----------------- feed-forward -----------------
    h1 = jnp.maximum(_mm(x, ff1_w[0], ff1_b[0]), 0.0)
    ff = _mm(h1, ff2_w[0], ff2_b[0])
    x = _layernorm(x + ff, n3_w[0], n3_b[0], eps)

    x_acc[...] = x
    @pl.when(layer == n_layers - 1)
    def _():
        o_ref[...] = x.astype(o_ref.dtype)


def decoder_stack(x2, memory, stacked, *, batch, seq_len, num_heads, eps=1e-5):
    """Run all decoder layers in one pallas_call.

    x2:      (B*S, H) float32 residual stream
    memory:  (B, 1, H) image-feature memory (sequence length 1)
    stacked: dict of per-layer weights stacked along a leading layer axis
    Returns (B*S, H) bfloat16.
    """
    BS, H = x2.shape
    L = stacked['sa_qkv_w'].shape[0]
    # Split the batch into two "parallel" blocks when possible so v7x's two
    # TensorCores both work, while still folding batch into the matmul M dim.
    if batch > 1 and batch % 2 == 0:
        nb, bb = 2, batch // 2
    else:
        nb, bb = batch, 1
    weights = [stacked[name] for name in _STACK_ORDER]

    def _wspec(arr):
        zeros = (0,) * (arr.ndim - 1)
        return pl.BlockSpec((1,) + tuple(arr.shape[1:]),
                            lambda i, l, z=zeros: (l,) + z)

    kern = functools.partial(_decoder_stack_kernel, num_heads=num_heads,
                             bb=bb, seq_len=seq_len, eps=eps)
    # NOTE: for large models, 2x (double-buffered) per-layer bf16 weights must
    # fit VMEM (fine up to ~H=1024, F=4H on v7x's 64 MiB).
    return pl.pallas_call(
        kern,
        out_shape=jax.ShapeDtypeStruct((BS, H), jnp.bfloat16),
        grid=(nb, L),
        in_specs=[pl.BlockSpec((bb * seq_len, H), lambda i, l: (i, 0)),
                  pl.BlockSpec((bb, 1, H), lambda i, l: (i, 0, 0))]
                 + [_wspec(w) for w in weights],
        out_specs=pl.BlockSpec((bb * seq_len, H), lambda i, l: (i, 0)),
        scratch_shapes=[pltpu.VMEM((bb * seq_len, H), jnp.float32)],
        compiler_params=pltpu.CompilerParams(
            dimension_semantics=("parallel", "arbitrary")),
    )(x2, memory, *weights)


# ----------------------------------------------------------------------------
# Embedding projection + positional encoding (fused), and tiled linear
# ----------------------------------------------------------------------------
def _embed_proj_kernel(emb_ref, w_ref, b_ref, pe_ref, o_ref, *, scale, batch):
    e = (emb_ref[...].astype(jnp.float32) * scale).astype(w_ref.dtype)
    y = jnp.dot(e, w_ref[...], preferred_element_type=jnp.float32)
    y = y + b_ref[...].astype(jnp.float32)
    pe = pe_ref[...]
    if batch > 1:
        pe = jnp.concatenate([pe] * batch, axis=0)          # tile over batch
    o_ref[...] = (y + pe).astype(o_ref.dtype)


def embed_project(emb2, w, b, pe, *, scale, batch):
    """(emb2 * scale) @ w + b + pe on the flattened (B*S, E) slab."""
    M, E = emb2.shape
    H = w.shape[1]
    kern = functools.partial(_embed_proj_kernel, scale=scale, batch=batch)
    return pl.pallas_call(
        kern,
        out_shape=jax.ShapeDtypeStruct((M, H), jnp.float32),
        grid=(1,),
        in_specs=[pl.BlockSpec((M, E), lambda i: (0, 0)),
                  pl.BlockSpec((E, H), lambda i: (0, 0)),
                  pl.BlockSpec((1, H), lambda i: (0, 0)),
                  pl.BlockSpec((M // batch, H), lambda i: (0, 0))],
        out_specs=pl.BlockSpec((M, H), lambda i: (0, 0)),
    )(emb2, w, b, pe)


def _linear_kernel(x_ref, w_ref, b_ref, o_ref):
    y = jnp.dot(x_ref[...].astype(w_ref.dtype), w_ref[...],
                preferred_element_type=jnp.float32)
    o_ref[...] = (y + b_ref[...].astype(jnp.float32)).astype(o_ref.dtype)


def linear(x, w, b, *, tm=256, tn=1024):
    """y = x @ w + b with w pre-transposed to (in, out); tiled over M and N."""
    M, K = x.shape
    N = w.shape[1]
    tm = min(tm, M)
    tn = min(tn, N)
    return pl.pallas_call(
        _linear_kernel,
        out_shape=jax.ShapeDtypeStruct((M, N), jnp.float32),
        grid=(pl.cdiv(M, tm), pl.cdiv(N, tn)),
        in_specs=[pl.BlockSpec((tm, K), lambda i, j: (i, 0)),
                  pl.BlockSpec((K, tn), lambda i, j: (0, j)),
                  pl.BlockSpec((1, tn), lambda i, j: (0, j))],
        out_specs=pl.BlockSpec((tm, tn), lambda i, j: (i, j)),
        compiler_params=pltpu.CompilerParams(
            dimension_semantics=("parallel", "parallel")),
    )(x, w, b)


# ----------------------------------------------------------------------------
# Full decoder forward (matches PyTorch Decoder.forward, inference mode)
# ----------------------------------------------------------------------------
def decoder_forward(params, features, captions, *, embed_size, hidden_size,
                    num_heads):
    tgt = captions[:, :-1]                                    # (B, S)
    B, S = tgt.shape
    H = hidden_size
    scale = math.sqrt(embed_size)
    pe = params['pe'][:S]                                     # (S, H)

    # TODO(synk): token-embedding gather is data-dependent; kept in plain JAX.
    emb = jnp.take(params['embedding'], tgt, axis=0)          # (B, S, E)
    emb2 = emb.reshape(B * S, embed_size)

    if embed_size != hidden_size:
        x = embed_project(emb2, params['proj_w'], params['proj_b'], pe,
                          scale=scale, batch=B)               # (B*S, H) f32
        memory = linear(features, params['proj_w'], params['proj_b'])  # (B, H)
    else:
        # embed_proj is nn.Identity in this configuration.
        x = emb2 * scale + jnp.tile(pe, (B, 1))
        memory = features
    memory = memory.reshape(B, 1, H)                          # Sk == 1
    # dropout: eval mode -> identity

    x = decoder_stack(x, memory, params['layers'],
                      batch=B, seq_len=S, num_heads=num_heads)  # (B*S, H) bf16

    logits = linear(x, params['fc_w'], params['fc_b'])
    return logits.reshape(B, S, -1)


# ----------------------------------------------------------------------------
# Parameter construction (PyTorch layout -> pre-transposed / pre-split / bf16,
# stacked along a leading layer axis for the layer-grid kernel)
# ----------------------------------------------------------------------------
def make_positional_encoding(max_len, d_model):
    position = jnp.arange(max_len, dtype=jnp.float32)[:, None]
    div_term = jnp.exp(jnp.arange(0, d_model, 2, dtype=jnp.float32)
                       * (-math.log(10000.0) / d_model))
    pe = jnp.zeros((max_len, d_model), jnp.float32)
    pe = pe.at[:, 0::2].set(jnp.sin(position * div_term))
    pe = pe.at[:, 1::2].set(jnp.cos(position * div_term))
    return pe


def init_params(key, embed_size, hidden_size, vocab_size, num_heads, num_layers,
                ffn_size, max_len=64):
    wdt = WEIGHT_DTYPE
    H, F, E = hidden_size, ffn_size, embed_size
    Dh = H // num_heads

    def u(k, shape):
        return jax.random.uniform(k, shape, jnp.float32, -0.1, 0.1)

    def w_t(k, out_dim, in_dim):
        # torch nn.Linear weight (out, in) -> stored pre-transposed (in, out).
        return u(k, (out_dim, in_dim)).T.astype(wdt)

    keys = jax.random.split(key, 4 + num_layers)
    params = {
        'embedding': u(keys[0], (vocab_size, E)),
        'proj_w': w_t(keys[1], H, E),                         # (E, H)
        'proj_b': u(keys[2], (1, H)),
        'fc_w': w_t(keys[3], vocab_size, H),                  # (H, V)
        'fc_b': jnp.zeros((1, vocab_size), jnp.float32),
        'pe': make_positional_encoding(max_len, H),
    }

    layer_lists = {name: [] for name in _STACK_ORDER}
    for li in range(num_layers):
        lk = jax.random.split(keys[4 + li], 8)
        sa_in = u(lk[0], (3 * H, H))                          # in_proj_weight
        sa_out = u(lk[1], (H, H))                             # out_proj.weight
        ca_in = u(lk[2], (3 * H, H))
        ca_out = u(lk[3], (H, H))
        vals = {
            'sa_qkv_w': sa_in.T.astype(wdt),                  # (H, 3H) fused QKV
            'sa_qkv_b': jnp.zeros((1, 3 * H), jnp.float32),
            # out-proj weight pre-transposed (in,out) and pre-split per head,
            # so the head-concat folds into the projection in-kernel.
            'sa_out_w': sa_out.T.reshape(num_heads, Dh, H).astype(wdt),
            'sa_out_b': jnp.zeros((1, H), jnp.float32),
            'n1_w': jnp.ones((1, H), jnp.float32),
            'n1_b': jnp.zeros((1, H), jnp.float32),
            # cross-attention with memory length 1: only the V projection and
            # the out-projection are mathematically needed.
            'ca_v_w': ca_in[2 * H:].T.astype(wdt),            # (H, H)
            'ca_v_b': jnp.zeros((1, H), jnp.float32),
            'ca_out_w': ca_out.T.astype(wdt),                 # (H, H)
            'ca_out_b': jnp.zeros((1, H), jnp.float32),
            'n2_w': jnp.ones((1, H), jnp.float32),
            'n2_b': jnp.zeros((1, H), jnp.float32),
            'ff1_w': w_t(lk[4], F, H),                        # (H, F)
            'ff1_b': u(lk[5], (1, F)),
            'ff2_w': w_t(lk[6], H, F),                        # (F, H)
            'ff2_b': u(lk[7], (1, H)),
            'n3_w': jnp.ones((1, H), jnp.float32),
            'n3_b': jnp.zeros((1, H), jnp.float32),
        }
        for name in _STACK_ORDER:
            layer_lists[name].append(vals[name])
    params['layers'] = {name: jnp.stack(layer_lists[name])
                        for name in _STACK_ORDER}
    return params


if __name__ == "__main__":
    # Small shapes consistent with the module's forward.
    embed_size, hidden_size, vocab_size = 32, 64, 128
    num_heads, num_layers, ffn_size = 4, 2, 128
    batch, cap_len = 2, 9            # tgt = captions[:, :-1] -> seq_len = 8

    key = jax.random.PRNGKey(0)
    kp, kf, kc = jax.random.split(key, 3)
    params = init_params(kp, embed_size, hidden_size, vocab_size,
                         num_heads, num_layers, ffn_size)
    features = jax.random.normal(kf, (batch, embed_size), jnp.float32)
    captions = jax.random.randint(kc, (batch, cap_len), 0, vocab_size)

    fwd = jax.jit(functools.partial(decoder_forward,
                                    embed_size=embed_size,
                                    hidden_size=hidden_size,
                                    num_heads=num_heads))
    out = jax.block_until_ready(fwd(params, features, captions))
    assert out.shape == (batch, cap_len - 1, vocab_size)
    assert bool(jnp.all(jnp.isfinite(out)))
    print("KERNEL_OK")
</pallas_src>

<mosaic_0001>
module attributes {stable_mosaic.version = 11 : i64} {
  func.func @_embed_proj_kernel(%arg0: i32, %arg1: memref<16x32xf32, #tpu.memory_space<vmem>>, %arg2: memref<32x64xbf16, #tpu.memory_space<vmem>>, %arg3: memref<1x64xf32, #tpu.memory_space<vmem>>, %arg4: memref<8x64xf32, #tpu.memory_space<vmem>>, %arg5: memref<16x64xf32, #tpu.memory_space<vmem>>) attributes {dimension_semantics = [#tpu.dimension_semantics<arbitrary>], iteration_bounds = array<i64: 1>, scalar_prefetch = 0 : i64, scratch_operands = 0 : i64, tpu.core_type = #tpu.core_type<tc>, window_params = [{pipeline_mode = #tpu.pipeline_mode<synchronous>, transform_indices = @transform_0, window_bounds = array<i64: 16, 32>}, {pipeline_mode = #tpu.pipeline_mode<synchronous>, transform_indices = @transform_1, window_bounds = array<i64: 32, 64>}, {pipeline_mode = #tpu.pipeline_mode<synchronous>, transform_indices = @transform_2, window_bounds = array<i64: 1, 64>}, {pipeline_mode = #tpu.pipeline_mode<synchronous>, transform_indices = @transform_3, window_bounds = array<i64: 8, 64>}, {pipeline_mode = #tpu.pipeline_mode<synchronous>, transform_indices = @transform_4, window_bounds = array<i64: 16, 64>}]} {
    %c0 = arith.constant 0 : index
    %c0_0 = arith.constant 0 : index
    %0 = vector.load %arg1[%c0, %c0_0] : memref<16x32xf32, #tpu.memory_space<vmem>>, vector<16x32xf32>
    %cst = arith.constant 5.65685415 : f32
    %1 = vector.broadcast %cst : f32 to vector<16x32xf32>
    %2 = arith.mulf %0, %1 : vector<16x32xf32>
    %3 = arith.truncf %2 : vector<16x32xf32> to vector<16x32xbf16>
    %c0_1 = arith.constant 0 : index
    %c0_2 = arith.constant 0 : index
    %4 = vector.load %arg2[%c0_1, %c0_2] : memref<32x64xbf16, #tpu.memory_space<vmem>>, vector<32x64xbf16>
    %cst_3 = arith.constant dense<0.000000e+00> : vector<16x64xf32>
    %5 = tpu.matmul %3, %4, %cst_3 {dimension_numbers = #tpu.dot_dimension_numbers<[1], [0], [0], [1], [0, 0, 1, 1], [], []>} : vector<16x32xbf16>, vector<32x64xbf16>, vector<16x64xf32> -> vector<16x64xf32>
    %c0_4 = arith.constant 0 : index
    %c0_5 = arith.constant 0 : index
    %6 = vector.load %arg3[%c0_4, %c0_5] : memref<1x64xf32, #tpu.memory_space<vmem>>, vector<1x64xf32>
    %7 = vector.broadcast %6 : vector<1x64xf32> to vector<16x64xf32>
    %8 = arith.addf %5, %7 : vector<16x64xf32>
    %c0_6 = arith.constant 0 : index
    %c0_7 = arith.constant 0 : index
    %9 = vector.load %arg4[%c0_6, %c0_7] : memref<8x64xf32, #tpu.memory_space<vmem>>, vector<8x64xf32>
    %10 = tpu.concatenate %9, %9 in 0 : vector<8x64xf32>, vector<8x64xf32> -> vector<16x64xf32>
    %11 = arith.addf %8, %10 : vector<16x64xf32>
    %c0_8 = arith.constant 0 : index
    %c0_9 = arith.constant 0 : index
    %12 = vector.load %arg5[%c0_8, %c0_9] : memref<16x64xf32, #tpu.memory_space<vmem>>, vector<16x64xf32>
    tpu.vector_store %arg5[%c0_8, %c0_9], %11 {strides = array<i32>} : memref<16x64xf32, #tpu.memory_space<vmem>>, vector<16x64xf32>,
    return
  }
  func.func @transform_0(%arg0: i32) -> (i32, i32) {
    %c0_i32 = arith.constant 0 : i32
    %c0_i32_0 = arith.constant 0 : i32
    %c0_i32_1 = arith.constant 0 : i32
    return %c0_i32, %c0_i32_0 : i32, i32
  }
  func.func @transform_1(%arg0: i32) -> (i32, i32) {
    %c0_i32 = arith.constant 0 : i32
    %c0_i32_0 = arith.constant 0 : i32
    %c0_i32_1 = arith.constant 0 : i32
    return %c0_i32, %c0_i32_0 : i32, i32
  }
  func.func @transform_2(%arg0: i32) -> (i32, i32) {
    %c0_i32 = arith.constant 0 : i32
    %c0_i32_0 = arith.constant 0 : i32
    %c0_i32_1 = arith.constant 0 : i32
    return %c0_i32, %c0_i32_0 : i32, i32
  }
  func.func @transform_3(%arg0: i32) -> (i32, i32) {
    %c0_i32 = arith.constant 0 : i32
    %c0_i32_0 = arith.constant 0 : i32
    %c0_i32_1 = arith.constant 0 : i32
    return %c0_i32, %c0_i32_0 : i32, i32
  }
  func.func @transform_4(%arg0: i32) -> (i32, i32) {
    %c0_i32 = arith.constant 0 : i32
    %c0_i32_0 = arith.constant 0 : i32
    %c0_i32_1 = arith.constant 0 : i32
    return %c0_i32, %c0_i32_0 : i32, i32
  }
}

module attributes {stable_mosaic.version = 11 : i64} {
  func.func @_linear_kernel(%arg0: i32, %arg1: i32, %arg2: memref<2x32xf32, #tpu.memory_space<vmem>>, %arg3: memref<32x64xbf16, #tpu.memory_space<vmem>>, %arg4: memref<1x64xf32, #tpu.memory_space<vmem>>, %arg5: memref<2x64xf32, #tpu.memory_space<vmem>>) attributes {dimension_semantics = [#tpu.dimension_semantics<parallel>, #tpu.dimension_semantics<parallel>], iteration_bounds = array<i64: 1, 1>, scalar_prefetch = 0 : i64, scratch_operands = 0 : i64, tpu.core_type = #tpu.core_type<tc>, window_params = [{transform_indices = @transform_0, window_bounds = array<i64: 2, 32>}, {transform_indices = @transform_1, window_bounds = array<i64: 32, 64>}, {transform_indices = @transform_2, window_bounds = array<i64: 1, 64>}, {transform_indices = @transform_3, window_bounds = array<i64: 2, 64>}]} {
    %c0 = arith.constant 0 : index
    %c0_0 = arith.constant 0 : index
    %0 = vector.load %arg2[%c0, %c0_0] : memref<2x32xf32, #tpu.memory_space<vmem>>, vector<2x32xf32>
    %1 = arith.truncf %0 : vector<2x32xf32> to vector<2x32xbf16>
    %c0_1 = arith.constant 0 : index
    %c0_2 = arith.constant 0 : index
    %2 = vector.load %arg3[%c0_1, %c0_2] : memref<32x64xbf16, #tpu.memory_space<vmem>>, vector<32x64xbf16>
    %cst = arith.constant dense<0.000000e+00> : vector<2x64xf32>
    %3 = tpu.matmul %1, %2, %cst {dimension_numbers = #tpu.dot_dimension_numbers<[1], [0], [0], [1], [0, 0, 1, 1], [], []>} : vector<2x32xbf16>, vector<32x64xbf16>, vector<2x64xf32> -> vector<2x64xf32>
    %c0_3 = arith.constant 0 : index
    %c0_4 = arith.constant 0 : index
    %4 = vector.load %arg4[%c0_3, %c0_4] : memref<1x64xf32, #tpu.memory_space<vmem>>, vector<1x64xf32>
    %5 = vector.broadcast %4 : vector<1x64xf32> to vector<2x64xf32>
    %6 = arith.addf %3, %5 : vector<2x64xf32>
    %c0_5 = arith.constant 0 : index
    %c0_6 = arith.constant 0 : index
    %7 = vector.load %arg5[%c0_5, %c0_6] : memref<2x64xf32, #tpu.memory_space<vmem>>, vector<2x64xf32>
    tpu.vector_store %arg5[%c0_5, %c0_6], %6 {strides = array<i32>} : memref<2x64xf32, #tpu.memory_space<vmem>>, vector<2x64xf32>,
    return
  }
  func.func @transform_0(%arg0: i32, %arg1: i32) -> (i32, i32) {
    %c0_i32 = arith.constant 0 : i32
    %c0_i32_0 = arith.constant 0 : i32
    return %arg0, %c0_i32 : i32, i32
  }
  func.func @transform_1(%arg0: i32, %arg1: i32) -> (i32, i32) {
    %c0_i32 = arith.constant 0 : i32
    %c0_i32_0 = arith.constant 0 : i32
    return %c0_i32, %arg1 : i32, i32
  }
  func.func @transform_2(%arg0: i32, %arg1: i32) -> (i32, i32) {
    %c0_i32 = arith.constant 0 : i32
    %c0_i32_0 = arith.constant 0 : i32
    return %c0_i32, %arg1 : i32, i32
  }
  func.func @transform_3(%arg0: i32, %arg1: i32) -> (i32, i32) {
    %c0_i32 = arith.constant 0 : i32
    return %arg0, %arg1 : i32, i32
  }
}

module attributes {stable_mosaic.version = 11 : i64} {
  func.func @_linear_kernel(%arg0: i32, %arg1: i32, %arg2: memref<16x64xbf16, #tpu.memory_space<vmem>>, %arg3: memref<64x128xbf16, #tpu.memory_space<vmem>>, %arg4: memref<1x128xf32, #tpu.memory_space<vmem>>, %arg5: memref<16x128xf32, #tpu.memory_space<vmem>>) attributes {dimension_semantics = [#tpu.dimension_semantics<parallel>, #tpu.dimension_semantics<parallel>], iteration_bounds = array<i64: 1, 1>, scalar_prefetch = 0 : i64, scratch_operands = 0 : i64, tpu.core_type = #tpu.core_type<tc>, window_params = [{transform_indices = @transform_0, window_bounds = array<i64: 16, 64>}, {transform_indices = @transform_1, window_bounds = array<i64: 64, 128>}, {transform_indices = @transform_2, window_bounds = array<i64: 1, 128>}, {transform_indices = @transform_3, window_bounds = array<i64: 16, 128>}]} {
    %c0 = arith.constant 0 : index
    %c0_0 = arith.constant 0 : index
    %0 = vector.load %arg2[%c0, %c0_0] : memref<16x64xbf16, #tpu.memory_space<vmem>>, vector<16x64xbf16>
    %c0_1 = arith.constant 0 : index
    %c0_2 = arith.constant 0 : index
    %1 = vector.load %arg3[%c0_1, %c0_2] : memref<64x128xbf16, #tpu.memory_space<vmem>>, vector<64x128xbf16>
    %cst = arith.constant dense<0.000000e+00> : vector<16x128xf32>
    %2 = tpu.matmul %0, %1, %cst {dimension_numbers = #tpu.dot_dimension_numbers<[1], [0], [0], [1], [0, 0, 1, 1], [], []>} : vector<16x64xbf16>, vector<64x128xbf16>, vector<16x128xf32> -> vector<16x128xf32>
    %c0_3 = arith.constant 0 : index
    %c0_4 = arith.constant 0 : index
    %3 = vector.load %arg4[%c0_3, %c0_4] : memref<1x128xf32, #tpu.memory_space<vmem>>, vector<1x128xf32>
    %4 = vector.broadcast %3 : vector<1x128xf32> to vector<16x128xf32>
    %5 = arith.addf %2, %4 : vector<16x128xf32>
    %c0_5 = arith.constant 0 : index
    %c0_6 = arith.constant 0 : index
    %6 = vector.load %arg5[%c0_5, %c0_6] : memref<16x128xf32, #tpu.memory_space<vmem>>, vector<16x128xf32>
    tpu.vector_store %arg5[%c0_5, %c0_6], %5 {strides = array<i32>} : memref<16x128xf32, #tpu.memory_space<vmem>>, vector<16x128xf32>,
    return
  }
  func.func @transform_0(%arg0: i32, %arg1: i32) -> (i32, i32) {
    %c0_i32 = arith.constant 0 : i32
    %c0_i32_0 = arith.constant 0 : i32
    return %arg0, %c0_i32 : i32, i32
  }
  func.func @transform_1(%arg0: i32, %arg1: i32) -> (i32, i32) {
    %c0_i32 = arith.constant 0 : i32
    %c0_i32_0 = arith.constant 0 : i32
    return %c0_i32, %arg1 : i32, i32
  }
  func.func @transform_2(%arg0: i32, %arg1: i32) -> (i32, i32) {
    %c0_i32 = arith.constant 0 : i32
    %c0_i32_0 = arith.constant 0 : i32
    return %c0_i32, %arg1 : i32, i32
  }
  func.func @transform_3(%arg0: i32, %arg1: i32) -> (i32, i32) {
    %c0_i32 = arith.constant 0 : i32
    return %arg0, %arg1 : i32, i32
  }
}

module attributes {stable_mosaic.version = 11 : i64} {
  func.func @_decoder_stack_kernel(%arg0: i32, %arg1: i32, %arg2: memref<8x64xf32, #tpu.memory_space<vmem>>, %arg3: memref<1x1x64xf32, #tpu.memory_space<vmem>>, %arg4: memref<1x64x192xbf16, #tpu.memory_space<vmem>>, %arg5: memref<1x1x192xf32, #tpu.memory_space<vmem>>, %arg6: memref<1x4x16x64xbf16, #tpu.memory_space<vmem>>, %arg7: memref<1x1x64xf32, #tpu.memory_space<vmem>>, %arg8: memref<1x1x64xf32, #tpu.memory_space<vmem>>, %arg9: memref<1x1x64xf32, #tpu.memory_space<vmem>>, %arg10: memref<1x64x64xbf16, #tpu.memory_space<vmem>>, %arg11: memref<1x1x64xf32, #tpu.memory_space<vmem>>, %arg12: memref<1x64x64xbf16, #tpu.memory_space<vmem>>, %arg13: memref<1x1x64xf32, #tpu.memory_space<vmem>>, %arg14: memref<1x1x64xf32, #tpu.memory_space<vmem>>, %arg15: memref<1x1x64xf32, #tpu.memory_space<vmem>>, %arg16: memref<1x64x128xbf16, #tpu.memory_space<vmem>>, %arg17: memref<1x1x128xf32, #tpu.memory_space<vmem>>, %arg18: memref<1x128x64xbf16, #tpu.memory_space<vmem>>, %arg19: memref<1x1x64xf32, #tpu.memory_space<vmem>>, %arg20: memref<1x1x64xf32, #tpu.memory_space<vmem>>, %arg21: memref<1x1x64xf32, #tpu.memory_space<vmem>>, %arg22: memref<8x64xbf16, #tpu.memory_space<vmem>>, %arg23: memref<8x64xf32, #tpu.memory_space<vmem>>) attributes {dimension_semantics = [#tpu.dimension_semantics<parallel>, #tpu.dimension_semantics<arbitrary>], iteration_bounds = array<i64: 2, 2>, scalar_prefetch = 0 : i64, scratch_operands = 1 : i64, tpu.core_type = #tpu.core_type<tc>, window_params = [{transform_indices = @transform_0, window_bounds = array<i64: 8, 64>}, {transform_indices = @transform_1, window_bounds = array<i64: 1, 1, 64>}, {transform_indices = @transform_2, window_bounds = array<i64: 1, 64, 192>}, {transform_indices = @transform_3, window_bounds = array<i64: 1, 1, 192>}, {transform_indices = @transform_4, window_bounds = array<i64: 1, 4, 16, 64>}, {transform_indices = @transform_5, window_bounds = array<i64: 1, 1, 64>}, {transform_indices = @transform_6, window_bounds = array<i64: 1, 1, 64>}, {transform_indices = @transform_7, window_bounds = array<i64: 1, 1, 64>}, {transform_indices = @transform_8, window_bounds = array<i64: 1, 64, 64>}, {transform_indices = @transform_9, window_bounds = array<i64: 1, 1, 64>}, {transform_indices = @transform_10, window_bounds = array<i64: 1, 64, 64>}, {transform_indices = @transform_11, window_bounds = array<i64: 1, 1, 64>}, {transform_indices = @transform_12, window_bounds = array<i64: 1, 1, 64>}, {transform_indices = @transform_13, window_bounds = array<i64: 1, 1, 64>}, {transform_indices = @transform_14, window_bounds = array<i64: 1, 64, 128>}, {transform_indices = @transform_15, window_bounds = array<i64: 1, 1, 128>}, {transform_indices = @transform_16, window_bounds = array<i64: 1, 128, 64>}, {transform_indices = @transform_17, window_bounds = array<i64: 1, 1, 64>}, {transform_indices = @transform_18, window_bounds = array<i64: 1, 1, 64>}, {transform_indices = @transform_19, window_bounds = array<i64: 1, 1, 64>}, {transform_indices = @transform_20, window_bounds = array<i64: 8, 64>}]} {
    %c0_i32 = arith.constant 0 : i32
    %0 = arith.cmpi eq, %arg1, %c0_i32 : i32
    %1 = arith.extui %0 : i1 to i32
    %c0_i32_0 = arith.constant 0 : i32
    %2 = arith.cmpi ne, %1, %c0_i32_0 : i32
    scf.if %2 {
      %c0_92 = arith.constant 0 : index
      %c0_93 = arith.constant 0 : index
      %191 = vector.load %arg2[%c0_92, %c0_93] : memref<8x64xf32, #tpu.memory_space<vmem>>, vector<8x64xf32>
      %c0_94 = arith.constant 0 : index
      %c0_95 = arith.constant 0 : index
      %192 = vector.load %arg23[%c0_94, %c0_95] : memref<8x64xf32, #tpu.memory_space<vmem>>, vector<8x64xf32>
      tpu.vector_store %arg23[%c0_94, %c0_95], %191 {strides = array<i32>} : memref<8x64xf32, #tpu.memory_space<vmem>>, vector<8x64xf32>,
    } else {
    }
    %c0 = arith.constant 0 : index
    %c0_1 = arith.constant 0 : index
    %3 = vector.load %arg23[%c0, %c0_1] : memref<8x64xf32, #tpu.memory_space<vmem>>, vector<8x64xf32>
    %4 = tpu.iota {dimensions = array<i32: 0>} : vector<8x8xi32>
    %5 = tpu.iota {dimensions = array<i32: 1>} : vector<8x8xi32>
    %6 = arith.cmpi sle, %5, %4 : vector<8x8xi32>
    %cst = arith.constant 0.000000e+00 : f32
    %cst_2 = arith.constant -1.000000e+09 : f32
    %7 = vector.broadcast %cst : f32 to vector<8x8xf32>
    %8 = vector.broadcast %cst_2 : f32 to vector<8x8xf32>
    %9 = arith.select %6, %7, %8 : vector<8x8xi1>, vector<8x8xf32>
    %c0_3 = arith.constant 0 : index
    %c0_4 = arith.constant 0 : index
    %c0_5 = arith.constant 0 : index
    %10 = vector.load %arg4[%c0_3, %c0_4, %c0_5] : memref<1x64x192xbf16, #tpu.memory_space<vmem>>, vector<1x64x192xbf16>
    %11 = vector.shape_cast %10 : vector<1x64x192xbf16> to vector<64x192xbf16>
    %c0_6 = arith.constant 0 : index
    %c0_7 = arith.constant 0 : index
    %c0_8 = arith.constant 0 : index
    %12 = vector.load %arg5[%c0_6, %c0_7, %c0_8] : memref<1x1x192xf32, #tpu.memory_space<vmem>>, vector<1x1x192xf32>
    %13 = vector.shape_cast %12 : vector<1x1x192xf32> to vector<1x192xf32>
    %14 = arith.truncf %3 : vector<8x64xf32> to vector<8x64xbf16>
    %cst_9 = arith.constant dense<0.000000e+00> : vector<8x192xf32>
    %15 = tpu.matmul %14, %11, %cst_9 {dimension_numbers = #tpu.dot_dimension_numbers<[1], [0], [0], [1], [0, 0, 1, 1], [], []>} : vector<8x64xbf16>, vector<64x192xbf16>, vector<8x192xf32> -> vector<8x192xf32>
    %16 = vector.broadcast %13 : vector<1x192xf32> to vector<8x192xf32>
    %17 = arith.addf %15, %16 : vector<8x192xf32>
    %c0_10 = arith.constant 0 : index
    %c0_11 = arith.constant 0 : index
    %c0_12 = arith.constant 0 : index
    %c0_13 = arith.constant 0 : index
    %18 = vector.load %arg6[%c0_10, %c0_11, %c0_12, %c0_13] : memref<1x4x16x64xbf16, #tpu.memory_space<vmem>>, vector<1x4x16x64xbf16>
    %19 = vector.shape_cast %18 : vector<1x4x16x64xbf16> to vector<4x16x64xbf16>
    %20 = vector.extract_strided_slice %17 {offsets = [0, 0], sizes = [8, 16], strides = [1, 1]} : vector<8x192xf32> to vector<8x16xf32>
    %21 = vector.extract_strided_slice %17 {offsets = [0, 16], sizes = [8, 16], strides = [1, 1]} : vector<8x192xf32> to vector<8x16xf32>
    %22 = vector.extract_strided_slice %17 {offsets = [0, 32], sizes = [8, 16], strides = [1, 1]} : vector<8x192xf32> to vector<8x16xf32>
    %23 = vector.extract_strided_slice %17 {offsets = [0, 48], sizes = [8, 16], strides = [1, 1]} : vector<8x192xf32> to vector<8x16xf32>
    %24 = vector.shape_cast %20 : vector<8x16xf32> to vector<1x8x16xf32>
    %25 = vector.shape_cast %21 : vector<8x16xf32> to vector<1x8x16xf32>
    %26 = vector.shape_cast %22 : vector<8x16xf32> to vector<1x8x16xf32>
    %27 = vector.shape_cast %23 : vector<8x16xf32> to vector<1x8x16xf32>
    %28 = tpu.concatenate %24, %25, %26, %27 in 0 : vector<1x8x16xf32>, vector<1x8x16xf32>, vector<1x8x16xf32>, vector<1x8x16xf32> -> vector<4x8x16xf32>
    %29 = vector.extract_strided_slice %17 {offsets = [0, 64], sizes = [8, 16], strides = [1, 1]} : vector<8x192xf32> to vector<8x16xf32>
    %30 = vector.extract_strided_slice %17 {offsets = [0, 80], sizes = [8, 16], strides = [1, 1]} : vector<8x192xf32> to vector<8x16xf32>
    %31 = vector.extract_strided_slice %17 {offsets = [0, 96], sizes = [8, 16], strides = [1, 1]} : vector<8x192xf32> to vector<8x16xf32>
    %32 = vector.extract_strided_slice %17 {offsets = [0, 112], sizes = [8, 16], strides = [1, 1]} : vector<8x192xf32> to vector<8x16xf32>
    %33 = vector.shape_cast %29 : vector<8x16xf32> to vector<1x8x16xf32>
    %34 = vector.shape_cast %30 : vector<8x16xf32> to vector<1x8x16xf32>
    %35 = vector.shape_cast %31 : vector<8x16xf32> to vector<1x8x16xf32>
    %36 = vector.shape_cast %32 : vector<8x16xf32> to vector<1x8x16xf32>
    %37 = tpu.concatenate %33, %34, %35, %36 in 0 : vector<1x8x16xf32>, vector<1x8x16xf32>, vector<1x8x16xf32>, vector<1x8x16xf32> -> vector<4x8x16xf32>
    %38 = vector.extract_strided_slice %17 {offsets = [0, 128], sizes = [8, 16], strides = [1, 1]} : vector<8x192xf32> to vector<8x16xf32>
    %39 = vector.extract_strided_slice %17 {offsets = [0, 144], sizes = [8, 16], strides = [1, 1]} : vector<8x192xf32> to vector<8x16xf32>
    %40 = vector.extract_strided_slice %17 {offsets = [0, 160], sizes = [8, 16], strides = [1, 1]} : vector<8x192xf32> to vector<8x16xf32>
    %41 = vector.extract_strided_slice %17 {offsets = [0, 176], sizes = [8, 16], strides = [1, 1]} : vector<8x192xf32> to vector<8x16xf32>
    %42 = vector.shape_cast %38 : vector<8x16xf32> to vector<1x8x16xf32>
    %43 = vector.shape_cast %39 : vector<8x16xf32> to vector<1x8x16xf32>
    %44 = vector.shape_cast %40 : vector<8x16xf32> to vector<1x8x16xf32>
    %45 = vector.shape_cast %41 : vector<8x16xf32> to vector<1x8x16xf32>
    %46 = tpu.concatenate %42, %43, %44, %45 in 0 : vector<1x8x16xf32>, vector<1x8x16xf32>, vector<1x8x16xf32>, vector<1x8x16xf32> -> vector<4x8x16xf32>
    "tpu.trace_start"() <{level = 10 : i32, message = "hqd,hkd->hqk"}> : () -> ()
    %cst_14 = arith.constant dense<0.000000e+00> : vector<4x8x8xf32>
    %47 = tpu.matmul %28, %37, %cst_14 {dimension_numbers = #tpu.dot_dimension_numbers<[2], [2], [1], [1], [0, 0, 0, 1, 1, 1], [0], [0]>} : vector<4x8x16xf32>, vector<4x8x16xf32>, vector<4x8x8xf32> -> vector<4x8x8xf32>
    "tpu.trace_stop"() : () -> ()
    %cst_15 = arith.constant 2.500000e-01 : f32
    %48 = vector.broadcast %cst_15 : f32 to vector<4x8x8xf32>
    %49 = arith.mulf %47, %48 : vector<4x8x8xf32>
    %50 = vector.shape_cast %9 : vector<8x8xf32> to vector<1x8x8xf32>
    %51 = vector.broadcast %50 : vector<1x8x8xf32> to vector<4x8x8xf32>
    %52 = arith.addf %49, %51 : vector<4x8x8xf32>
    %cst_16 = arith.constant dense<0xFF800000> : vector<4x8xf32>
    %53 = vector.multi_reduction <maximumf>, %52, %cst_16 [2] : vector<4x8x8xf32> to vector<4x8xf32>
    %54 = vector.shape_cast %53 : vector<4x8xf32> to vector<4x8x1xf32>
    %55 = vector.broadcast %54 : vector<4x8x1xf32> to vector<4x8x8xf32>
    %56 = arith.subf %52, %55 : vector<4x8x8xf32>
    %57 = math.exp %56 : vector<4x8x8xf32>
    %cst_17 = arith.constant dense<0.000000e+00> : vector<4x8xf32>
    %58 = vector.multi_reduction <add>, %57, %cst_17 [2] : vector<4x8x8xf32> to vector<4x8xf32>
    %59 = vector.shape_cast %58 : vector<4x8xf32> to vector<4x8x1xf32>
    %60 = vector.broadcast %59 : vector<4x8x1xf32> to vector<4x8x8xf32>
    %61 = arith.divf %57, %60 : vector<4x8x8xf32>
    "tpu.trace_start"() <{level = 10 : i32, message = "hqk,hkd->hqd"}> : () -> ()
    %cst_18 = arith.constant dense<0.000000e+00> : vector<4x8x16xf32>
    %62 = tpu.matmul %61, %46, %cst_18 {dimension_numbers = #tpu.dot_dimension_numbers<[2], [1], [1], [2], [0, 0, 0, 1, 1, 2], [0], [0]>} : vector<4x8x8xf32>, vector<4x8x16xf32>, vector<4x8x16xf32> -> vector<4x8x16xf32>
    "tpu.trace_stop"() : () -> ()
    %63 = arith.truncf %62 : vector<4x8x16xf32> to vector<4x8x16xbf16>
    "tpu.trace_start"() <{level = 10 : i32, message = "hsd,hdo->hso"}> : () -> ()
    %cst_19 = arith.constant dense<0.000000e+00> : vector<4x8x64xf32>
    %64 = tpu.matmul %63, %19, %cst_19 {dimension_numbers = #tpu.dot_dimension_numbers<[2], [1], [1], [2], [0, 0, 0, 1, 1, 2], [0], [0]>} : vector<4x8x16xbf16>, vector<4x16x64xbf16>, vector<4x8x64xf32> -> vector<4x8x64xf32>
    "tpu.trace_stop"() : () -> ()
    %cst_20 = arith.constant dense<0.000000e+00> : vector<8x64xf32>
    %65 = vector.multi_reduction <add>, %64, %cst_20 [0] : vector<4x8x64xf32> to vector<8x64xf32>
    %c0_21 = arith.constant 0 : index
    %c0_22 = arith.constant 0 : index
    %c0_23 = arith.constant 0 : index
    %66 = vector.load %arg7[%c0_21, %c0_22, %c0_23] : memref<1x1x64xf32, #tpu.memory_space<vmem>>, vector<1x1x64xf32>
    %67 = vector.shape_cast %66 : vector<1x1x64xf32> to vector<1x64xf32>
    %68 = vector.broadcast %67 : vector<1x64xf32> to vector<8x64xf32>
    %69 = arith.addf %65, %68 : vector<8x64xf32>
    %70 = arith.addf %3, %69 : vector<8x64xf32>
    %c0_24 = arith.constant 0 : index
    %c0_25 = arith.constant 0 : index
    %c0_26 = arith.constant 0 : index
    %71 = vector.load %arg8[%c0_24, %c0_25, %c0_26] : memref<1x1x64xf32, #tpu.memory_space<vmem>>, vector<1x1x64xf32>
    %72 = vector.shape_cast %71 : vector<1x1x64xf32> to vector<1x64xf32>
    %c0_27 = arith.constant 0 : index
    %c0_28 = arith.constant 0 : index
    %c0_29 = arith.constant 0 : index
    %73 = vector.load %arg9[%c0_27, %c0_28, %c0_29] : memref<1x1x64xf32, #tpu.memory_space<vmem>>, vector<1x1x64xf32>
    %74 = vector.shape_cast %73 : vector<1x1x64xf32> to vector<1x64xf32>
    %cst_30 = arith.constant dense<0.000000e+00> : vector<8xf32>
    %75 = vector.multi_reduction <add>, %70, %cst_30 [1] : vector<8x64xf32> to vector<8xf32>
    %76 = vector.shape_cast %75 : vector<8xf32> to vector<8x1xf32>
    %cst_31 = arith.constant 6.400000e+01 : f32
    %77 = vector.broadcast %cst_31 : f32 to vector<8x1xf32>
    %78 = arith.divf %76, %77 : vector<8x1xf32>
    %79 = vector.broadcast %78 : vector<8x1xf32> to vector<8x64xf32>
    %80 = arith.subf %70, %79 : vector<8x64xf32>
    %81 = arith.mulf %80, %80 : vector<8x64xf32>
    %cst_32 = arith.constant dense<0.000000e+00> : vector<8xf32>
    %82 = vector.multi_reduction <add>, %81, %cst_32 [1] : vector<8x64xf32> to vector<8xf32>
    %83 = vector.shape_cast %82 : vector<8xf32> to vector<8x1xf32>
    %cst_33 = arith.constant 6.400000e+01 : f32
    %84 = vector.broadcast %cst_33 : f32 to vector<8x1xf32>
    %85 = arith.divf %83, %84 : vector<8x1xf32>
    %86 = vector.broadcast %78 : vector<8x1xf32> to vector<8x64xf32>
    %87 = arith.subf %70, %86 : vector<8x64xf32>
    %cst_34 = arith.constant 9.99999974E-6 : f32
    %88 = vector.broadcast %cst_34 : f32 to vector<8x1xf32>
    %89 = arith.addf %85, %88 : vector<8x1xf32>
    %90 = math.rsqrt %89 : vector<8x1xf32>
    %91 = vector.broadcast %90 : vector<8x1xf32> to vector<8x64xf32>
    %92 = arith.mulf %87, %91 : vector<8x64xf32>
    %93 = vector.broadcast %72 : vector<1x64xf32> to vector<8x64xf32>
    %94 = arith.mulf %92, %93 : vector<8x64xf32>
    %95 = vector.broadcast %74 : vector<1x64xf32> to vector<8x64xf32>
    %96 = arith.addf %94, %95 : vector<8x64xf32>
    %c0_35 = arith.constant 0 : index
    %c0_36 = arith.constant 0 : index
    %c0_37 = arith.constant 0 : index
    %97 = vector.load %arg3[%c0_35, %c0_36, %c0_37] : memref<1x1x64xf32, #tpu.memory_space<vmem>>, vector<1x1x64xf32>
    %98 = vector.shape_cast %97 : vector<1x1x64xf32> to vector<1x64xf32>
    %c0_38 = arith.constant 0 : index
    %c0_39 = arith.constant 0 : index
    %c0_40 = arith.constant 0 : index
    %99 = vector.load %arg10[%c0_38, %c0_39, %c0_40] : memref<1x64x64xbf16, #tpu.memory_space<vmem>>, vector<1x64x64xbf16>
    %100 = vector.shape_cast %99 : vector<1x64x64xbf16> to vector<64x64xbf16>
    %c0_41 = arith.constant 0 : index
    %c0_42 = arith.constant 0 : index
    %c0_43 = arith.constant 0 : index
    %101 = vector.load %arg11[%c0_41, %c0_42, %c0_43] : memref<1x1x64xf32, #tpu.memory_space<vmem>>, vector<1x1x64xf32>
    %102 = vector.shape_cast %101 : vector<1x1x64xf32> to vector<1x64xf32>
    %103 = arith.truncf %98 : vector<1x64xf32> to vector<1x64xbf16>
    %cst_44 = arith.constant dense<0.000000e+00> : vector<1x64xf32>
    %104 = tpu.matmul %103, %100, %cst_44 {dimension_numbers = #tpu.dot_dimension_numbers<[1], [0], [0], [1], [0, 0, 1, 1], [], []>} : vector<1x64xbf16>, vector<64x64xbf16>, vector<1x64xf32> -> vector<1x64xf32>
    %105 = arith.addf %104, %102 : vector<1x64xf32>
    %c0_45 = arith.constant 0 : index
    %c0_46 = arith.constant 0 : index
    %c0_47 = arith.constant 0 : index
    %106 = vector.load %arg12[%c0_45, %c0_46, %c0_47] : memref<1x64x64xbf16, #tpu.memory_space<vmem>>, vector<1x64x64xbf16>
    %107 = vector.shape_cast %106 : vector<1x64x64xbf16> to vector<64x64xbf16>
    %c0_48 = arith.constant 0 : index
    %c0_49 = arith.constant 0 : index
    %c0_50 = arith.constant 0 : index
    %108 = vector.load %arg13[%c0_48, %c0_49, %c0_50] : memref<1x1x64xf32, #tpu.memory_space<vmem>>, vector<1x1x64xf32>
    %109 = vector.shape_cast %108 : vector<1x1x64xf32> to vector<1x64xf32>
    %110 = arith.truncf %105 : vector<1x64xf32> to vector<1x64xbf16>
    %cst_51 = arith.constant dense<0.000000e+00> : vector<1x64xf32>
    %111 = tpu.matmul %110, %107, %cst_51 {dimension_numbers = #tpu.dot_dimension_numbers<[1], [0], [0], [1], [0, 0, 1, 1], [], []>} : vector<1x64xbf16>, vector<64x64xbf16>, vector<1x64xf32> -> vector<1x64xf32>
    %112 = arith.addf %111, %109 : vector<1x64xf32>
    %113 = vector.shape_cast %112 : vector<1x64xf32> to vector<1x64xf32>
    %114 = vector.broadcast %113 : vector<1x64xf32> to vector<8x64xf32>
    %115 = arith.addf %96, %114 : vector<8x64xf32>
    %c0_52 = arith.constant 0 : index
    %c0_53 = arith.constant 0 : index
    %c0_54 = arith.constant 0 : index
    %116 = vector.load %arg14[%c0_52, %c0_53, %c0_54] : memref<1x1x64xf32, #tpu.memory_space<vmem>>, vector<1x1x64xf32>
    %117 = vector.shape_cast %116 : vector<1x1x64xf32> to vector<1x64xf32>
    %c0_55 = arith.constant 0 : index
    %c0_56 = arith.constant 0 : index
    %c0_57 = arith.constant 0 : index
    %118 = vector.load %arg15[%c0_55, %c0_56, %c0_57] : memref<1x1x64xf32, #tpu.memory_space<vmem>>, vector<1x1x64xf32>
    %119 = vector.shape_cast %118 : vector<1x1x64xf32> to vector<1x64xf32>
    %cst_58 = arith.constant dense<0.000000e+00> : vector<8xf32>
    %120 = vector.multi_reduction <add>, %115, %cst_58 [1] : vector<8x64xf32> to vector<8xf32>
    %121 = vector.shape_cast %120 : vector<8xf32> to vector<8x1xf32>
    %cst_59 = arith.constant 6.400000e+01 : f32
    %122 = vector.broadcast %cst_59 : f32 to vector<8x1xf32>
    %123 = arith.divf %121, %122 : vector<8x1xf32>
    %124 = vector.broadcast %123 : vector<8x1xf32> to vector<8x64xf32>
    %125 = arith.subf %115, %124 : vector<8x64xf32>
    %126 = arith.mulf %125, %125 : vector<8x64xf32>
    %cst_60 = arith.constant dense<0.000000e+00> : vector<8xf32>
    %127 = vector.multi_reduction <add>, %126, %cst_60 [1] : vector<8x64xf32> to vector<8xf32>
    %128 = vector.shape_cast %127 : vector<8xf32> to vector<8x1xf32>
    %cst_61 = arith.constant 6.400000e+01 : f32
    %129 = vector.broadcast %cst_61 : f32 to vector<8x1xf32>
    %130 = arith.divf %128, %129 : vector<8x1xf32>
    %131 = vector.broadcast %123 : vector<8x1xf32> to vector<8x64xf32>
    %132 = arith.subf %115, %131 : vector<8x64xf32>
    %cst_62 = arith.constant 9.99999974E-6 : f32
    %133 = vector.broadcast %cst_62 : f32 to vector<8x1xf32>
    %134 = arith.addf %130, %133 : vector<8x1xf32>
    %135 = math.rsqrt %134 : vector<8x1xf32>
    %136 = vector.broadcast %135 : vector<8x1xf32> to vector<8x64xf32>
    %137 = arith.mulf %132, %136 : vector<8x64xf32>
    %138 = vector.broadcast %117 : vector<1x64xf32> to vector<8x64xf32>
    %139 = arith.mulf %137, %138 : vector<8x64xf32>
    %140 = vector.broadcast %119 : vector<1x64xf32> to vector<8x64xf32>
    %141 = arith.addf %139, %140 : vector<8x64xf32>
    %c0_63 = arith.constant 0 : index
    %c0_64 = arith.constant 0 : index
    %c0_65 = arith.constant 0 : index
    %142 = vector.load %arg16[%c0_63, %c0_64, %c0_65] : memref<1x64x128xbf16, #tpu.memory_space<vmem>>, vector<1x64x128xbf16>
    %143 = vector.shape_cast %142 : vector<1x64x128xbf16> to vector<64x128xbf16>
    %c0_66 = arith.constant 0 : index
    %c0_67 = arith.constant 0 : index
    %c0_68 = arith.constant 0 : index
    %144 = vector.load %arg17[%c0_66, %c0_67, %c0_68] : memref<1x1x128xf32, #tpu.memory_space<vmem>>, vector<1x1x128xf32>
    %145 = vector.shape_cast %144 : vector<1x1x128xf32> to vector<1x128xf32>
    %146 = arith.truncf %141 : vector<8x64xf32> to vector<8x64xbf16>
    %cst_69 = arith.constant dense<0.000000e+00> : vector<8x128xf32>
    %147 = tpu.matmul %146, %143, %cst_69 {dimension_numbers = #tpu.dot_dimension_numbers<[1], [0], [0], [1], [0, 0, 1, 1], [], []>} : vector<8x64xbf16>, vector<64x128xbf16>, vector<8x128xf32> -> vector<8x128xf32>
    %148 = vector.broadcast %145 : vector<1x128xf32> to vector<8x128xf32>
    %149 = arith.addf %147, %148 : vector<8x128xf32>
    %cst_70 = arith.constant 0.000000e+00 : f32
    %150 = vector.broadcast %cst_70 : f32 to vector<8x128xf32>
    %151 = arith.maximumf %149, %150 : vector<8x128xf32>
    %c0_71 = arith.constant 0 : index
    %c0_72 = arith.constant 0 : index
    %c0_73 = arith.constant 0 : index
    %152 = vector.load %arg18[%c0_71, %c0_72, %c0_73] : memref<1x128x64xbf16, #tpu.memory_space<vmem>>, vector<1x128x64xbf16>
    %153 = vector.shape_cast %152 : vector<1x128x64xbf16> to vector<128x64xbf16>
    %c0_74 = arith.constant 0 : index
    %c0_75 = arith.constant 0 : index
    %c0_76 = arith.constant 0 : index
    %154 = vector.load %arg19[%c0_74, %c0_75, %c0_76] : memref<1x1x64xf32, #tpu.memory_space<vmem>>, vector<1x1x64xf32>
    %155 = vector.shape_cast %154 : vector<1x1x64xf32> to vector<1x64xf32>
    %156 = arith.truncf %151 : vector<8x128xf32> to vector<8x128xbf16>
    %cst_77 = arith.constant dense<0.000000e+00> : vector<8x64xf32>
    %157 = tpu.matmul %156, %153, %cst_77 {dimension_numbers = #tpu.dot_dimension_numbers<[1], [0], [0], [1], [0, 0, 1, 1], [], []>} : vector<8x128xbf16>, vector<128x64xbf16>, vector<8x64xf32> -> vector<8x64xf32>
    %158 = vector.broadcast %155 : vector<1x64xf32> to vector<8x64xf32>
    %159 = arith.addf %157, %158 : vector<8x64xf32>
    %160 = arith.addf %141, %159 : vector<8x64xf32>
    %c0_78 = arith.constant 0 : index
    %c0_79 = arith.constant 0 : index
    %c0_80 = arith.constant 0 : index
    %161 = vector.load %arg20[%c0_78, %c0_79, %c0_80] : memref<1x1x64xf32, #tpu.memory_space<vmem>>, vector<1x1x64xf32>
    %162 = vector.shape_cast %161 : vector<1x1x64xf32> to vector<1x64xf32>
    %c0_81 = arith.constant 0 : index
    %c0_82 = arith.constant 0 : index
    %c0_83 = arith.constant 0 : index
    %163 = vector.load %arg21[%c0_81, %c0_82, %c0_83] : memref<1x1x64xf32, #tpu.memory_space<vmem>>, vector<1x1x64xf32>
    %164 = vector.shape_cast %163 : vector<1x1x64xf32> to vector<1x64xf32>
    %cst_84 = arith.constant dense<0.000000e+00> : vector<8xf32>
    %165 = vector.multi_reduction <add>, %160, %cst_84 [1] : vector<8x64xf32> to vector<8xf32>
    %166 = vector.shape_cast %165 : vector<8xf32> to vector<8x1xf32>
    %cst_85 = arith.constant 6.400000e+01 : f32
    %167 = vector.broadcast %cst_85 : f32 to vector<8x1xf32>
    %168 = arith.divf %166, %167 : vector<8x1xf32>
    %169 = vector.broadcast %168 : vector<8x1xf32> to vector<8x64xf32>
    %170 = arith.subf %160, %169 : vector<8x64xf32>
    %171 = arith.mulf %170, %170 : vector<8x64xf32>
    %cst_86 = arith.constant dense<0.000000e+00> : vector<8xf32>
    %172 = vector.multi_reduction <add>, %171, %cst_86 [1] : vector<8x64xf32> to vector<8xf32>
    %173 = vector.shape_cast %172 : vector<8xf32> to vector<8x1xf32>
    %cst_87 = arith.constant 6.400000e+01 : f32
    %174 = vector.broadcast %cst_87 : f32 to vector<8x1xf32>
    %175 = arith.divf %173, %174 : vector<8x1xf32>
    %176 = vector.broadcast %168 : vector<8x1xf32> to vector<8x64xf32>
    %177 = arith.subf %160, %176 : vector<8x64xf32>
    %cst_88 = arith.constant 9.99999974E-6 : f32
    %178 = vector.broadcast %cst_88 : f32 to vector<8x1xf32>
    %179 = arith.addf %175, %178 : vector<8x1xf32>
    %180 = math.rsqrt %179 : vector<8x1xf32>
    %181 = vector.broadcast %180 : vector<8x1xf32> to vector<8x64xf32>
    %182 = arith.mulf %177, %181 : vector<8x64xf32>
    %183 = vector.broadcast %162 : vector<1x64xf32> to vector<8x64xf32>
    %184 = arith.mulf %182, %183 : vector<8x64xf32>
    %185 = vector.broadcast %164 : vector<1x64xf32> to vector<8x64xf32>
    %186 = arith.addf %184, %185 : vector<8x64xf32>
    %c0_89 = arith.constant 0 : index
    %c0_90 = arith.constant 0 : index
    %187 = vector.load %arg23[%c0_89, %c0_90] : memref<8x64xf32, #tpu.memory_space<vmem>>, vector<8x64xf32>
    tpu.vector_store %arg23[%c0_89, %c0_90], %186 {strides = array<i32>} : memref<8x64xf32, #tpu.memory_space<vmem>>, vector<8x64xf32>,
    %c1_i32 = arith.constant 1 : i32
    %188 = arith.cmpi eq, %arg1, %c1_i32 : i32
    %189 = arith.extui %188 : i1 to i32
    %c0_i32_91 = arith.constant 0 : i32
    %190 = arith.cmpi ne, %189, %c0_i32_91 : i32
    scf.if %190 {
      %191 = arith.truncf %186 : vector<8x64xf32> to vector<8x64xbf16>
      %c0_92 = arith.constant 0 : index
      %c0_93 = arith.constant 0 : index
      %192 = vector.load %arg22[%c0_92, %c0_93] : memref<8x64xbf16, #tpu.memory_space<vmem>>, vector<8x64xbf16>
      tpu.vector_store %arg22[%c0_92, %c0_93], %191 {strides = array<i32>} : memref<8x64xbf16, #tpu.memory_space<vmem>>, vector<8x64xbf16>,
    } else {
    }
    return
  }
  func.func @transform_0(%arg0: i32, %arg1: i32) -> (i32, i32) {
    %c0_i32 = arith.constant 0 : i32
    %c0_i32_0 = arith.constant 0 : i32
    return %arg0, %c0_i32 : i32, i32
  }
  func.func @transform_1(%arg0: i32, %arg1: i32) -> (i32, i32, i32) {
    %c0_i32 = arith.constant 0 : i32
    %c0_i32_0 = arith.constant 0 : i32
    %c0_i32_1 = arith.constant 0 : i32
    return %arg0, %c0_i32, %c0_i32_0 : i32, i32, i32
  }
  func.func @transform_2(%arg0: i32, %arg1: i32) -> (i32, i32, i32) {
    %c0_i32 = arith.constant 0 : i32
    %c0_i32_0 = arith.constant 0 : i32
    %c0_i32_1 = arith.constant 0 : i32
    return %arg1, %c0_i32, %c0_i32_0 : i32, i32, i32
  }
  func.func @transform_3(%arg0: i32, %arg1: i32) -> (i32, i32, i32) {
    %c0_i32 = arith.constant 0 : i32
    %c0_i32_0 = arith.constant 0 : i32
    %c0_i32_1 = arith.constant 0 : i32
    return %arg1, %c0_i32, %c0_i32_0 : i32, i32, i32
  }
  func.func @transform_4(%arg0: i32, %arg1: i32) -> (i32, i32, i32, i32) {
    %c0_i32 = arith.constant 0 : i32
    %c0_i32_0 = arith.constant 0 : i32
    %c0_i32_1 = arith.constant 0 : i32
    %c0_i32_2 = arith.constant 0 : i32
    return %arg1, %c0_i32, %c0_i32_0, %c0_i32_1 : i32, i32, i32, i32
  }
  func.func @transform_5(%arg0: i32, %arg1: i32) -> (i32, i32, i32) {
    %c0_i32 = arith.constant 0 : i32
    %c0_i32_0 = arith.constant 0 : i32
    %c0_i32_1 = arith.constant 0 : i32
    return %arg1, %c0_i32, %c0_i32_0 : i32, i32, i32
  }
  func.func @transform_6(%arg0: i32, %arg1: i32) -> (i32, i32, i32) {
    %c0_i32 = arith.constant 0 : i32
    %c0_i32_0 = arith.constant 0 : i32
    %c0_i32_1 = arith.constant 0 : i32
    return %arg1, %c0_i32, %c0_i32_0 : i32, i32, i32
  }
  func.func @transform_7(%arg0: i32, %arg1: i32) -> (i32, i32, i32) {
    %c0_i32 = arith.constant 0 : i32
    %c0_i32_0 = arith.constant 0 : i32
    %c0_i32_1 = arith.constant 0 : i32
    return %arg1, %c0_i32, %c0_i32_0 : i32, i32, i32
  }
  func.func @transform_8(%arg0: i32, %arg1: i32) -> (i32, i32, i32) {
    %c0_i32 = arith.constant 0 : i32
    %c0_i32_0 = arith.constant 0 : i32
    %c0_i32_1 = arith.constant 0 : i32
    return %arg1, %c0_i32, %c0_i32_0 : i32, i32, i32
  }
  func.func @transform_9(%arg0: i32, %arg1: i32) -> (i32, i32, i32) {
    %c0_i32 = arith.constant 0 : i32
    %c0_i32_0 = arith.constant 0 : i32
    %c0_i32_1 = arith.constant 0 : i32
    return %arg1, %c0_i32, %c0_i32_0 : i32, i32, i32
  }
  func.func @transform_10(%arg0: i32, %arg1: i32) -> (i32, i32, i32) {
    %c0_i32 = arith.constant 0 : i32
    %c0_i32_0 = arith.constant 0 : i32
    %c0_i32_1 = arith.constant 0 : i32
    return %arg1, %c0_i32, %c0_i32_0 : i32, i32, i32
  }
  func.func @transform_11(%arg0: i32, %arg1: i32) -> (i32, i32, i32) {
    %c0_i32 = arith.constant 0 : i32
    %c0_i32_0 = arith.constant 0 : i32
    %c0_i32_1 = arith.constant 0 : i32
    return %arg1, %c0_i32, %c0_i32_0 : i32, i32, i32
  }
  func.func @transform_12(%arg0: i32, %arg1: i32) -> (i32, i32, i32) {
    %c0_i32 = arith.constant 0 : i32
    %c0_i32_0 = arith.constant 0 : i32
    %c0_i32_1 = arith.constant 0 : i32
    return %arg1, %c0_i32, %c0_i32_0 : i32, i32, i32
  }
  func.func @transform_13(%arg0: i32, %arg1: i32) -> (i32, i32, i32) {
    %c0_i32 = arith.constant 0 : i32
    %c0_i32_0 = arith.constant 0 : i32
    %c0_i32_1 = arith.constant 0 : i32
    return %arg1, %c0_i32, %c0_i32_0 : i32, i32, i32
  }
  func.func @transform_14(%arg0: i32, %arg1: i32) -> (i32, i32, i32) {
    %c0_i32 = arith.constant 0 : i32
    %c0_i32_0 = arith.constant 0 : i32
    %c0_i32_1 = arith.constant 0 : i32
    return %arg1, %c0_i32, %c0_i32_0 : i32, i32, i32
  }
  func.func @transform_15(%arg0: i32, %arg1: i32) -> (i32, i32, i32) {
    %c0_i32 = arith.constant 0 : i32
    %c0_i32_0 = arith.constant 0 : i32
    %c0_i32_1 = arith.constant 0 : i32
    return %arg1, %c0_i32, %c0_i32_0 : i32, i32, i32
  }
  func.func @transform_16(%arg0: i32, %arg1: i32) -> (i32, i32, i32) {
    %c0_i32 = arith.constant 0 : i32
    %c0_i32_0 = arith.constant 0 : i32
    %c0_i32_1 = arith.constant 0 : i32
    return %arg1, %c0_i32, %c0_i32_0 : i32, i32, i32
  }
  func.func @transform_17(%arg0: i32, %arg1: i32) -> (i32, i32, i32) {
    %c0_i32 = arith.constant 0 : i32
    %c0_i32_0 = arith.constant 0 : i32
    %c0_i32_1 = arith.constant 0 : i32
    return %arg1, %c0_i32, %c0_i32_0 : i32, i32, i32
  }
  func.func @transform_18(%arg0: i32, %arg1: i32) -> (i32, i32, i32) {
    %c0_i32 = arith.constant 0 : i32
    %c0_i32_0 = arith.constant 0 : i32
    %c0_i32_1 = arith.constant 0 : i32
    return %arg1, %c0_i32, %c0_i32_0 : i32, i32, i32
  }
  func.func @transform_19(%arg0: i32, %arg1: i32) -> (i32, i32, i32) {
    %c0_i32 = arith.constant 0 : i32
    %c0_i32_0 = arith.constant 0 : i32
    %c0_i32_1 = arith.constant 0 : i32
    return %arg1, %c0_i32, %c0_i32_0 : i32, i32, i32
  }
  func.func @transform_20(%arg0: i32, %arg1: i32) -> (i32, i32) {
    %c0_i32 = arith.constant 0 : i32
    %c0_i32_0 = arith.constant 0 : i32
    return %arg0, %c0_i32 : i32, i32
  }
}

</mosaic_0001>

<bundles_post_ra>
// kernel: decoder_forward.4
= control target key start
LH: loop header
LB: loop body
LE: loop exit
PB: predicated region body
PF: predicated region fallthrough
CT: control target
= control target key end

     0   :  { %v120_v0 = vmov 0.0   ;;  %vm121_vm0 = vmmov 0   ;;  %vm46_vm1 = vcmask 261120   ;;  %vm94_vm2 = vcmask 523264   ;;  %s171_s1 = inlined_call_operand.vmem [shape: bf16[32,64], index: 1, kind: input, shape index: {}]   ;;  %s172_s0 = inlined_call_operand.vmem [shape: f32[16,32], index: 0, kind: input, shape index: {}]   ;;  %s173_s2 = inlined_call_operand.vmem [shape: f32[1,64], index: 2, kind: input, shape index: {}]   ;;  %s174_s3 = inlined_call_operand.vmem [shape: f32[8,64], index: 3, kind: input, shape index: {}]   ;;  %s175_s4 = inlined_call_operand.vmem [shape: f32[16,64], index: 4, kind: output, shape index: {}]  }
   0x1   :  { %108 = vmatprep.subr.bf16.mxu0 %v120_v0  ;;  %v118_v1 = vld [vmem:[%s171_s1 + $0x8] sm:$0xff]   ;;  %112 = vmatprep.mubr.msk.bf16.mxu0 %vm121_vm0, %v120_v0  ;;  %v119_v2 = vld [vmem:[%s171_s1] sm:$0xff]  }
   0x2   :  { %109 = vmatpush3.bf16.msra.mxu0 %v118_v1  ;;  %v18_v3 = vld [vmem:[%s172_s0] sm:$0xff]  ;;  %v19_v4 = vld [vmem:[%s172_s0 + $0x8] sm:$0xff] }
   0x3   :  { %110 = vmatprep.subr.bf16.mxu0 %v120_v0  ;;  %v20_v5 = vmul.f32 5.656854, %v18_v3  ;;  %v21_v6 = vmul.f32 5.656854, %v19_v4  ;;  %v101_v8 = vld [vmem:[%s173_s2] ss:$0 sm:$0xff] }
   0x4   :  { %v91_v10 = vld [vmem:[%s174_s3] sm:$0xff] }
   0x5   :  { %v22_v7 = vpack.c.bf16 %v21_v6, %v20_v5 }
   0x6   :  { %111 = vmatpush3.bf16.msra.mxu0 %v119_v2 }
   0x9   :  { %113 = vmatmul.mubr.msk.bf16.vlgmr.msra.gmra.mxu0 %vm46_vm1, %v22_v7 }
  0xc9   :  { %v84_v9 = vpop.f32.mrf.mxu0 }
  0xca   :  { %v85_v11 = vadd.f32 %v101_v8, %v84_v9 }
  0xcb   :  { %v114_v12 = vpop.f32.mrf.mxu0 }
  0xcc   :  { %v92_v13 = vadd.f32 %v91_v10, %v85_v11 }
  0xcd   :  { %v87_v14 = vpop.f32.mrf.mxu0 }
  0xce   :  { %95 = vst.msk [vmem:[%s175_s4] sm:$0xff] %vm94_vm2, %v92_v13  ;;  %v88_v15 = vadd.f32 %v101_v8, %v87_v14 }
  0xcf   :  { %v115_v16 = vpop.f32.mrf.mxu0 }
  0xd0   :  { %v93_v17 = vadd.f32 %v91_v10, %v88_v15 }
  0xd2   :  { %96 = vst.msk [vmem:[%s175_s4 + $0x8] sm:$0xff] %vm94_vm2, %v93_v17 }

// kernel: decoder_forward.5
= control target key start
LH: loop header
LB: loop body
LE: loop exit
PB: predicated region body
PF: predicated region fallthrough
CT: control target
= control target key end

     0   :  { %v109_v0 = vmov 0.0   ;;  %vm110_vm0 = vmmov 0   ;;  %vm40_vm1 = vcmask 261120   ;;  %vm84_vm2 = vcmask 517120   ;;  %s146_s1 = inlined_call_operand.vmem [shape: bf16[32,64], index: 1, kind: input, shape index: {}]   ;;  %s147_s0 = inlined_call_operand.vmem [shape: f32[2,32], index: 0, kind: input, shape index: {}]   ;;  %s148_s2 = inlined_call_operand.vmem [shape: f32[1,64], index: 2, kind: input, shape index: {}]   ;;  %s149_s3 = inlined_call_operand.vmem [shape: f32[2,64], index: 3, kind: output, shape index: {}]  }
   0x1   :  { %97 = vmatprep.subr.bf16.mxu0 %v109_v0  ;;  %v107_v1 = vld [vmem:[%s146_s1 + $0x8] sm:$0xff]   ;;  %101 = vmatprep.mubr.msk.bf16.mxu0 %vm110_vm0, %v109_v0  ;;  %v108_v2 = vld [vmem:[%s146_s1] sm:$0xff]  }
   0x2   :  { %98 = vmatpush3.bf16.msra.mxu0 %v107_v1  ;;  %v15_v3 = vld [vmem:[%s147_s0] sm:$0x3] }
   0x3   :  { %99 = vmatprep.subr.bf16.mxu0 %v109_v0  ;;  %v16_v4 = vpack.c.bf16 %v15_v3, %v15_v3  ;;  %v90_v5 = vld [vmem:[%s148_s2] ss:$0 sm:$0xff] }
   0x6   :  { %100 = vmatpush3.bf16.msra.mxu0 %v108_v2 }
   0x9   :  { %102 = vmatmul.mubr.msk.bf16.vlgmr.msra.gmra.mxu0 %vm40_vm1, %v16_v4 }
  0xc9   :  { %v78_v6 = vpop.f32.mrf.mxu0 }
  0xca   :  { %v79_v7 = vadd.f32 %v90_v5, %v78_v6 }
  0xcb   :  { %v103_v8 = vpop.f32.mrf.mxu0 }
  0xcc   :  { %85 = vst.msk [vmem:[%s149_s3] sm:$0x3] %vm84_vm2, %v79_v7 }
  0xcd   :  { %v81_v9 = vpop.f32.mrf.mxu0 }
  0xcf   :  { %v104_v10 = vpop.f32.mrf.mxu0 }

// kernel: decoder_forward.7
= control target key start
LH: loop header
LB: loop body
LE: loop exit
PB: predicated region body
PF: predicated region fallthrough
CT: control target
= control target key end

     0   :  { %v181_v1 = vmov 0.0   ;;  %vm182_vm0 = vmmov 0   ;;  %s227_s0 = inlined_call_operand.vmem [shape: bf16[16,64], index: 0, kind: input, shape index: {}]   ;;  %s228_s1 = inlined_call_operand.vmem [shape: bf16[64,128], index: 1, kind: input, shape index: {}]   ;;  %s229_s2 = inlined_call_operand.vmem [shape: f32[1,128], index: 2, kind: input, shape index: {}]   ;;  %s230_s3 = inlined_call_operand.hbm [shape: f32[16,128], index: 3, kind: output, shape index: {}]  }
   0x1   :  { %v154_v0 = vld [vmem:[%s228_s1 + $0x18] sm:$0xff]   ;;  %137 = vmatprep.subr.bf16.mxu0 %v181_v1  ;;  %v155_v2 = vld [vmem:[%s228_s1 + $0x10] sm:$0xff]   ;;  %145 = vmatprep.mubr.msk.bf16.mxu0 %vm182_vm0, %v181_v1 }
   0x2   :  { %138 = vmatpush3.bf16.msra.mxu0 %v154_v0 }
   0x3   :  { %139 = vmatprep.subr.bf16.mxu0 %v181_v1 }
   0x4   :  { %8 = vsyncpa [#allocation3], 0  ;;  %v156_v3 = vld [vmem:[%s228_s1 + $0x8] sm:$0xff]   ;;  %v157_v4 = vld [vmem:[%s228_s1] sm:$0xff]   ;;  %vm62_vm1 = vcmask 523264   ;;  %s183_s24 = smov [#allocation2]  }
   0x5   :  { %v158_v5 = vld [vmem:[%s227_s0] sm:$0xff]   ;;  %s114_s25 = sshll.u32 %s183_s24, 4  ;;  %s115_s25 = int_to_ptr.vmem [resolvable:$true] %s114_s25 }
   0x6   :  { %140 = vmatpush3.bf16.msra.mxu0 %v155_v2  ;;  %v125_v6 = vld [vmem:[%s229_s2] ss:$0 sm:$0xff]  ;;  %s159_s1 = scalar_lea.vmem %s115_s25, 256  ;;  %p164_p1 = scmp.lt.s32.totalorder %s115_s25, %s115_s25 }
   0x7   :  { %141 = vmatprep.subr.bf16.mxu0 %v181_v1  ;;  %p160_p0 = scmp.ne.s32.totalorder %s115_s25, %s159_s1  ;;  %p165_p2 = scmp.lt.s32.totalorder %s159_s1, %s159_s1 }
   0x9   :  { %p166_p3 = por %p165_p2, %p164_p1 }
   0xa   :  { %142 = vmatpush3.bf16.msra.mxu0 %v156_v3 }
   0xb   :  { %143 = vmatprep.subr.bf16.mxu0 %v181_v1  ;;  %p167_p4 = pnand %p166_p3, %p160_p0 }
   0xe   :  { %144 = vmatpush3.bf16.msra.mxu0 %v157_v4 }
  0x11   :  { %146 = vmatmul.mubr.msk.bf16.vlgmr.msra.gmra.mxu0 %vm62_vm1, %v158_v5 }
  0xd1   :  { %v100_v7 = vpop.f32.mrf.mxu0 }
  0xd2   :  { %v101_v8 = vadd.f32 %v125_v6, %v100_v7 }
  0xd3   :  { %v147_v9 = vpop.f32.mrf.mxu0 }
  0xd4   :  { %107 = vst [vmem:[#allocation2] sm:$0xff] %v101_v8 }
  0xd5   :  { %v103_v10 = vpop.f32.mrf.mxu0 }
  0xd6   :  { %v104_v11 = vadd.f32 %v125_v6, %v103_v10 }
  0xd7   :  { %v148_v12 = vpop.f32.mrf.mxu0 }
  0xd8   :  { %108 = vst [vmem:[#allocation2 + $0x8] sm:$0xff] %v104_v11 }
  0xd9   :  { %170 = shalt.err (!%p167_p4)
}
  0xda   :  { %s184_s0 = smov 128   ;;  %s185_s2 = smov 8  }
  0xdb   :  { %120 = dma.vmem_to_hbm [thread:$0]  %s115_s25, 256, %s230_s3, [#allocation3], %s184_s0, %s184_s0, %s185_s2  }
  0xdc   :  { %179 = dma.done.wait [#allocation3], 256  }
  0xdd   :  { %180 = vsyncadd [#allocation3], 4294967040 }
  0xde   :  { %124 = vsyncpa [#allocation3], 1 }

// kernel: decoder_forward.6
= control target key start
LH: loop header
LB: loop body
LE: loop exit
PB: predicated region body
PF: predicated region fallthrough
CT: control target
= control target key end

     0   :  { %s3183_s22 = smov 0   ;;  %s3185_s23 = smov 0   ;;  %s3549_s0 = inlined_call_operand.vmem [shape: f32[16,64], index: 0, kind: input, shape index: {}]   ;;  %s3550_s1 = inlined_call_operand.vmem [shape: f32[2,1,64], index: 1, kind: input, shape index: {}]   ;;  %s3551_s2 = inlined_call_operand.vmem [shape: bf16[2,64,192], index: 2, kind: input, shape index: {}]   ;;  %s3552_s3 = inlined_call_operand.vmem [shape: f32[2,1,192], index: 3, kind: input, shape index: {}]   ;;  %s3553_s4 = inlined_call_operand.vmem [shape: bf16[2,4,16,64], index: 4, kind: input, shape index: {}]   ;;  %s3554_s5 = inlined_call_operand.vmem [shape: f32[2,1,64], index: 5, kind: input, shape index: {}]   ;;  %s3555_s6 = inlined_call_operand.vmem [shape: f32[2,1,64], index: 6, kind: input, shape index: {}]   ;;  %s3556_s7 = inlined_call_operand.vmem [shape: f32[2,1,64], index: 7, kind: input, shape index: {}]   ;;  %s3557_s8 = inlined_call_operand.vmem [shape: bf16[2,64,64], index: 8, kind: input, shape index: {}]   ;;  %s3558_s9 = inlined_call_operand.vmem [shape: f32[2,1,64], index: 9, kind: input, shape index: {}]   ;;  %s3559_s10 = inlined_call_operand.vmem [shape: bf16[2,64,64], index: 10, kind: input, shape index: {}]   ;;  %s3560_s11 = inlined_call_operand.vmem [shape: f32[2,1,64], index: 11, kind: input, shape index: {}]   ;;  %s3561_s12 = inlined_call_operand.vmem [shape: f32[2,1,64], index: 12, kind: input, shape index: {}]   ;;  %s3562_s13 = inlined_call_operand.vmem [shape: f32[2,1,64], index: 13, kind: input, shape index: {}]   ;;  %s3563_s14 = inlined_call_operand.vmem [shape: bf16[2,64,128], index: 14, kind: input, shape index: {}]   ;;  %s3564_s15 = inlined_call_operand.vmem [shape: f32[2,1,128], index: 15, kind: input, shape index: {}]   ;;  %s3565_s16 = inlined_call_operand.vmem [shape: bf16[2,128,64], index: 16, kind: input, shape index: {}]   ;;  %s3566_s17 = inlined_call_operand.vmem [shape: f32[2,1,64], index: 17, kind: input, shape index: {}]   ;;  %s3567_s18 = inlined_call_operand.vmem [shape: f32[2,1,64], index: 18, kind: input, shape index: {}]   ;;  %s3568_s19 = inlined_call_operand.vmem [shape: f32[2,1,64], index: 19, kind: input, shape index: {}]   ;;  %s3569_s20 = inlined_call_operand.vmem [shape: bf16[16,64], index: 20, kind: output, shape index: {}]  }
   0x1   :  { %3577 = sst [smem:[#allocation13_spill]] %s3549_s0  ;;  %s3187_s24 = smov 0  }
   0x2   :  { %3578 = sst [smem:[#allocation14_spill]] %s3550_s1  ;;  %s3181_s1 = smov 0  }
   0x3   :  { %3579 = sst [smem:[#allocation15_spill]] %s3551_s2  ;;  %s3189_s2 = smov 0  }
   0x4   :  { %3580 = sst [smem:[#allocation16_spill]] %s3552_s3 }
   0x5   :  { %3581 = sst [smem:[#allocation17_spill]] %s3553_s4 }
   0x6   :  { %3582 = sst [smem:[#allocation18_spill]] %s3556_s7 }
   0x7   :  { %3583 = sst [smem:[#allocation19_spill]] %s3557_s8 }
   0x8   :  { %3584 = sst [smem:[#allocation20_spill]] %s3559_s10 }
   0x9   :  { %3585 = sst [smem:[#allocation21_spill]] %s3561_s12 }
   0xa   :  { %3586 = sst [smem:[#allocation22_spill]] %s3562_s13 }
   0xb   :  { %3587 = sst [smem:[#allocation23_spill]] %s3563_s14 }
   0xc   :  { %3588 = sst [smem:[#allocation24_spill]] %s3564_s15 }
   0xd   :  { %3589 = sst [smem:[#allocation25_spill]] %s3565_s16 }
   0xe   :  { %3590 = sst [smem:[#allocation26_spill]] %s3566_s17 }
   0xf   :  { %3591 = sst [smem:[#allocation27_spill]] %s3567_s18 }
  0x10   :  { %3592 = sst [smem:[#allocation28_spill]] %s3568_s19 }
  0x11   :  { %3593 = sst [smem:[#allocation29_spill]] %s3569_s20 }
  0x12 LB: > { %3594 = sst [smem:[#allocation3_spill]] %s3050_s1  ;;  %s39_s25 = sadd.s32 1, %s3058_s23  ;;  %s3066_s2 = sphi %s3189_s2, %s30_s2   ;;  %s3062_s24 = sphi %s3187_s24, %s3648_s24   ;;  %s3058_s23 = sphi %s3185_s23, %s3647_s23   ;;  %s3054_s22 = sphi %s3183_s22, %s3646_s22   ;;  %s3050_s1 = sphi %s3181_s1, %s3645_s1  }
  0x13   : > { %3595 = sst [smem:[#allocation4_spill]] %s3058_s23  ;;  %s42_s3 = sadd.s32 1, %s3062_s24 }
  0x14   : > { %3596 = sst [smem:[#allocation5_spill]] %s3062_s24  ;;  %p40_p0 = scmp.ge.s32.totalorder %s39_s25, 2 }
  0x15   : > { %3597 = sst [smem:[#allocation6_spill]] %s3066_s2  ;;  %p2667_p1 = scmp.ge.s32.totalorder %s3066_s2, 1 }
  0x16   : > { %p738_p2 = scmp.lt.s32.totalorder %s3066_s2, 5  ;;  %s3650_s25 = smov (%p40_p0, %s39_s25), 0 }
  0x17   : > { %3598 = sst [smem:[#allocation7_spill]] %s3650_s25  ;;  %s3652_s3 = smov (!%p40_p0, %s42_s3), %s3062_s24 }
  0x18   : > { %p739_p3 = pnand %p2667_p1, %p738_p2  ;;  %p44_p4 = scmp.ge.s32.totalorder %s3652_s3, 2 }
  0x1a   : > { %s3654_s3 = smov (%p44_p4, %s3652_s3), 0  ;;  %742 = sbr.rel (%p739_p3) target bundleno = 2801 (0xaf1), region = 100 }
  0x1b   : > { %3599 = sst [smem:[#allocation8_spill]] %s3654_s3 }
  0x1f   : > { %p864_p5 = scmp.lt.s32.totalorder %s3054_s22, 1  ;;  %p871_p6 = scmp.lt.s32.totalorder %s3050_s1, 1 }
  0x20   : > { %s3601_s3 = sld [smem:[#allocation13_spill]] }
  0x21   : > { %s3656_s22 = smov (!%p864_p5, %s3054_s22), 1  ;;  %s3604_s16 = sld [smem:[#allocation16_spill]] }
  0x22   : > { %s3217_s26 = scalar_select %p871_p6, %s3050_s1, 1 }
  0x23   : > { %s2668_s27 = sshll.u32 %s3656_s22, 3  ;;  %s3602_s1 = sld [smem:[#allocation15_spill]] }
  0x24   : > { %s2748_s24 = sshll.u32 %s3217_s26, 6  ;;  %s2671_s19 = sshll.u32 %s3217_s26, 1 }
  0x25   : > { %s2749_s4 = sshll.u32 %s3217_s26, 5  ;;  %s3606_s21 = sld [smem:[#allocation17_spill]] }
  0x26   : > { %s867_s25 = scalar_lea.vmem %s3601_s3, %s2668_s27  ;;  %s3609_s8 = sld [smem:[#allocation19_spill]] }
  0x27   : > { %s3237_s28 = scalar_lea.vmem %s3604_s16, %s2671_s19  ;;  %s3610_s10 = sld [smem:[#allocation20_spill]] }
  0x28   : > { %3605 = sst [smem:[#allocation10_spill]] %s3237_s28 }
  0x29   : > { %s3231_s20 = scalar_lea.vmem %s3602_s1, %s2748_s24  ;;  %s3613_s14 = sld [smem:[#allocation23_spill]] }
  0x2a   : > { %3603 = sst [smem:[#allocation9_spill]] %s3231_s20 }
  0x2b   : > { %s3243_s3 = scalar_lea.vmem %s3606_s21, %s2749_s4  ;;  %s3616_s2 = sld [smem:[#allocation25_spill]] }
  0x2c   : > { %3607 = sst [smem:[#allocation11_spill]] %s3243_s3  ;;  %s3260_s29 = scalar_lea.vmem %s3609_s8, %s2749_s4 }
  0x2d   : > { %s3269_s1 = scalar_lea.vmem %s3610_s10, %s2749_s4  ;;  %s3617_s19 = sld [smem:[#allocation26_spill]] }
  0x2e   : > { %s3618_s8 = sld [smem:[#allocation27_spill]] }
  0x2f   : > { %s3286_s21 = scalar_lea.vmem %s3613_s14, %s2749_s4  ;;  %s3619_s0 = sld [smem:[#allocation28_spill]] }
  0x30   : > { %3614 = sst [smem:[#allocation12_spill]] %s3286_s21  ;;  %s2682_s21 = sshll.u32 %s3656_s22, 2 }
  0x31   : > { %s3295_s17 = scalar_lea.vmem %s3616_s2, %s2748_s24  ;;  %s3620_s3 = sld [smem:[#allocation29_spill]] }
  0x32   : > { %s3621_s10 = sld [smem:[#allocation3_spill]] }
  0x33   : > { %s931_s12 = scalar_lea.vmem %s3617_s19, %s3217_s26 }
  0x34   : > { %s934_s13 = scalar_lea.vmem %s3618_s8, %s3217_s26 }
  0x35   : > { %s937_s14 = scalar_lea.vmem %s3619_s0, %s3217_s26 }
  0x37   : > { %s3313_s15 = scalar_lea.vmem %s3620_s3, %s2682_s21 }
  0x38   : > { %p2683_p7 = scmp.ne.s32.totalorder %s3621_s10, 0 }
  0x3a   : > { %946 = sbr.rel (%p2683_p7) target bundleno = 65 (0x41), region = 104 }
  0x3f   : > { %v947_v0 = vld [vmem:[%s867_s25] sm:$0xff]  ;;  %vm948_vm0 = vcmask 523264  }
  0x40   : > { %949 = vst.msk [vmem:[#allocation2] sm:$0xff] %vm948_vm0, %v947_v0 }
  0x41 PF: > { %s3622_s24 = sld [smem:[#allocation9_spill]]  ;;  %v3068_v3 = vmov 0   ;;  %vm1018_vm1 = vcmask 523264   ;;  %v951_v12 = vlaneseq  ;;  %v3069_v14 = vmov 0.0   ;;  %s3071_s25 = smov 80  }
  0x42   : > { %1054 = vmatprep.mubr.bf16.mxu0 %v3068_v3  ;;  %s3623_s8 = sld [smem:[#allocation10_spill]]  ;;  %2802 = vmatprep.subr.mxu1 %v3069_v14  ;;  %vm3070_vm2 = vmmov 0   ;;  %s3072_s3 = smov 112   ;;  %vm1090_vm3 = vcmask 130048   ;;  %v3075_v35 = vmov -1e+09  }
  0x43   : > { %v3329_v13 = vshrl.u32 %v951_v12, 7  ;;  %2804 = vmatprep.mubr.msk.f32.mxu1 %vm3070_vm2, %v3069_v14  ;;  %s3073_s19 = smov 64   ;;  %s3074_s21 = smov 96   ;;  %v954_v33 = vand.u32 127, %v951_v12  ;;  %vm1401_vm5 = vcmask 64512  }
  0x44   : > { %s3624_s30 = sld [smem:[#allocation11_spill]]  ;;  %s3627_s28 = scalar_lea.vmem %s3558_s9, %s3217_s26 }
  0x45   : > { %v970_v15 = vsub.s32 0, %v3329_v13  ;;  %v974_v28 = vsub.s32 1, %v3329_v13  ;;  %vm955_vm4 = vcmp.le.s32.totalorder %v954_v33, %v3329_v13  ;;  %s3625_s16 = sld [smem:[#allocation14_spill]]  ;;  %s3628_s4 = scalar_lea.vmem %s3554_s5, %s3217_s26 }
  0x46   : > { %v956_v36 = vsel %vm955_vm4, 0.0, %v3075_v35  ;;  %s3629_s23 = scalar_lea.vmem %s3560_s11, %s3217_s26  ;;  %s3638_s0 = sld [smem:[#allocation24_spill]] }
  0x47   : > { %v2970_v1 = vld [vmem:[%s3622_s24 + $0x34] ss:$8 sps:$4 sm:$0xff]   ;;  %v2972_v2 = vld [vmem:[%s3622_s24 + $0x30] ss:$8 sps:$4 sm:$0xff]   ;;  %v2973_v4 = vld [vmem:[%s3622_s24 + $0x24] ss:$8 sps:$4 sm:$0xff]  }
  0x48   : > { %1030 = vmatprep.subr.bf16.mxu0 %v2970_v1  ;;  %v2975_v5 = vld [vmem:[%s3622_s24 + $0x20] ss:$8 sps:$4 sm:$0xff]   ;;  %v2976_v6 = vld [vmem:[%s3622_s24 + $0x14] ss:$8 sps:$4 sm:$0xff]   ;;  %v2978_v7 = vld [vmem:[%s3622_s24 + $0x10] ss:$8 sps:$4 sm:$0xff]  }
  0x49   : > { %1031 = vmatpush1.bf16.msra.mxu0 %v2972_v2  ;;  %v2979_v8 = vld [vmem:[%s3622_s24 + $0x4] ss:$8 sps:$4 sm:$0xff]   ;;  %v2981_v9 = vld [vmem:[%s3622_s24] ss:$8 sps:$4 sm:$0xff]  }
  0x4a   : > { %1032 = vmatprep.subr.bf16.mxu0 %v2973_v4  ;;  %v3324_v10 = vld [vmem:[#allocation2] sm:$0xff]  ;;  %v2983_v33 = vld [vmem:[%s3624_s30 + $0x8] sm:$0xff]  }
  0x4b   : > { %v966_v11 = vpack.c.bf16 %v3324_v10, %v3324_v10  ;;  %v965_v16 = vld [vmem:[%s3623_s8] sm:$0x3]  ;;  %s3626_s20 = scalar_lea.vmem %s3625_s16, %s3656_s22  ;;  %s3630_s8 = scalar_lea.vmem %s3555_s6, %s3217_s26 }
  0x4c   : > { %v971_v17 = vrot.slane %v965_v16, %v970_v15  ;;  %v975_v30 = vrot.slane %v965_v16, %v974_v28  ;;  %s3634_s16 = sld [smem:[#allocation21_spill]]  ;;  %s3639_s27 = scalar_lea.vmem %s3638_s0, %s3217_s26 }
  0x4d   : > { %1033 = vmatpush1.bf16.msra.mxu0 %v2975_v5 }
  0x4e   : > { %1034 = vmatprep.subr.bf16.mxu0 %v2976_v6 }
  0x51   : > { %1035 = vmatpush1.bf16.msra.mxu0 %v2978_v7 }
  0x52   : > { %1036 = vmatprep.subr.bf16.mxu0 %v2979_v8 }
  0x55   : > { %1037 = vmatpush1.bf16.msra.mxu0 %v2981_v9 }
  0x56   : > { %2827 = vmatprep.subr.mxu0 %v3069_v14 }
  0x58   : > { %2692 = vmatmul.mubr.msk.bf16.vlgmr.msra.gmra.mxu0 %vm1018_vm1, %v966_v11 }
  0x59   : > { %2829 = vmatprep.mubr.msk.f32.mxu0 %vm3070_vm2, %v3069_v14 }
 0x118   : > { %v1056_v18 = vpop.f32.mrf.mxu0 }
 0x119   : > { %v1057_v19 = vadd.f32 %v1056_v18, %v971_v17 }
 0x11a   : > { %v1058_v20 = vpop.f32.mrf.mxu0 }
 0x11b   : > { %1076 = vrot.lane.b32.xlu1 %v1057_v19, %s3071_s25  ;;  %1072 = vrot.lane.b32.xlu0 %v1057_v19, %s3072_s3  ;;  %v1059_v32 = vadd.f32 %v1058_v20, %v975_v30 }
 0x11c   : > { %v1060_v21 = vpop.f32.mrf.mxu0 }
 0x11e   : > { %v1061_v22 = vpop.f32.mrf.mxu0 }
 0x11f   : > { %1088 = vrot.lane.b32.xlu1 %v1057_v19, %s3073_s19  ;;  %1074 = vrot.lane.b32.xlu0 %v1057_v19, %s3074_s21 }
 0x18d   : > { %v1077_v23 = vpop.permute.xlu1 %1076  ;;  %v1073_v24 = vpop.permute.xlu0 %1072 }
 0x18e   : > { %1165 = vrot.lane.b32.xlu0 %v1073_v24, %s3073_s19 }
 0x191   : > { %v1089_v25 = vpop.permute.xlu1 %1088  ;;  %v1075_v26 = vpop.permute.xlu0 %1074 }
 0x192   : > { %2803 = vmatpush3.xpose.msk.msra.mxu1 %vm1090_vm3, %v1089_v25  ;;  %1317 = vrot.lane.b32.xlu0 %v1077_v23, %s3073_s19 }
 0x193   : > { %1241 = vrot.lane.b32.xlu1 %v1075_v26, %s3073_s19  ;;  %2807 = vmatprep.subr.mxu1 %v3069_v14 }
 0x195   : > { %2805 = vmatmul.mubr.msk.f32.vlgmr.msra.gmra.mxu1 %vm1090_vm3, %v1057_v19 }
 0x196   : > { %2809 = vmatprep.mubr.msk.f32.mxu1 %vm3070_vm2, %v3069_v14 }
 0x200   : > { %v1166_v27 = vpop.permute.xlu0 %1165 }
 0x201   : > { %2808 = vmatpush3.xpose.msk.msra.mxu1 %vm1090_vm3, %v1166_v27  ;;  %v2982_v27 = vld [vmem:[%s3624_s30] sm:$0xff]  }
 0x202   : > { %2812 = vmatprep.subr.mxu1 %v3069_v14 }
 0x204   : > { %2810 = vmatmul.mubr.msk.f32.vlgmr.msra.gmra.mxu1 %vm1090_vm3, %v1073_v24  ;;  %v1318_v31 = vpop.permute.xlu0 %1317 }
 0x205   : > { %v1242_v29 = vpop.permute.xlu1 %1241  ;;  %2814 = vmatprep.mubr.msk.f32.mxu1 %vm3070_vm2, %v3069_v14 }
 0x206   : > { %2813 = vmatpush3.xpose.msk.msra.mxu1 %vm1090_vm3, %v1242_v29 }
 0x207   : > { %2817 = vmatprep.subr.mxu1 %v3069_v14 }
 0x209   : > { %2815 = vmatmul.mubr.msk.f32.vlgmr.msra.gmra.mxu1 %vm1090_vm3, %v1075_v26 }
 0x20a   : > { %2818 = vmatpush3.xpose.msk.msra.mxu1 %vm1090_vm3, %v1318_v31  ;;  %2819 = vmatprep.mubr.msk.f32.mxu1 %vm3070_vm2, %v3069_v14 }
 0x20b   : > { %2822 = vmatprep.subr.mxu1 %v3069_v14 }
 0x20d   : > { %2820 = vmatmul.mubr.msk.f32.vlgmr.msra.gmra.mxu1 %vm1090_vm3, %v1077_v23 }
 0x20e   : > { %2823 = vmatpush3.msra.mxu1 %v1059_v32  ;;  %2824 = vmatprep.mubr.msk.f32.mxu1 %vm3070_vm2, %v3069_v14 }
 0x20f   : > { %2832 = vmatprep.subr.mxu1 %v3069_v14 }
 0x255   : > { %v1161_v34 = vpop.f32.mrf.mxu1 }
 0x256   : > { %v1393_v37 = vmul.f32 0.25, %v1161_v34 }
 0x257   : > { %v2806_v38 = vpop.f32.mrf.mxu1 }
 0x258   : > { %v1397_v39 = vadd.f32 %v1393_v37, %v956_v36  ;;  %v2984_v38 = vld [vmem:[%s3624_s30 + $0x10] sm:$0xff]  }
 0x25a   : > { %v1402_v40 = vsel %vm1401_vm5, %v1397_v39, -inf }
 0x25b   : > { %1403 = vmax.xlane.f32.xlu1 %v1402_v40 }
 0x2c4   : > { %v1237_v41 = vpop.f32.mrf.mxu1 }
 0x2c5   : > { %v1394_v42 = vmul.f32 0.25, %v1237_v41 }
 0x2c6   : > { %v2811_v43 = vpop.f32.mrf.mxu1 }
 0x2c7   : > { %v1398_v44 = vadd.f32 %v1394_v42, %v956_v36  ;;  %v2986_v43 = vld [vmem:[%s3260_s29 + $0x18] sm:$0xff]  }
 0x2c9   : > { %v1313_v45 = vpop.f32.mrf.mxu1  ;;  %v1405_v46 = vsel %vm1401_vm5, %v1398_v44, -inf }
 0x2ca   : > { %v1395_v47 = vmul.f32 0.25, %v1313_v45  ;;  %1406 = vmax.xlane.f32.xlu0 %v1405_v46  ;;  %v2987_v45 = vld [vmem:[%s3260_s29 + $0x10] sm:$0xff]   ;;  %v2988_v46 = vld [vmem:[%s3260_s29 + $0x8] sm:$0xff]  }
 0x2cb   : > { %v2816_v48 = vpop.f32.mrf.mxu1 }
 0x2cc   : > { %v1399_v49 = vadd.f32 %v1395_v47, %v956_v36  ;;  %v2989_v47 = vld [vmem:[%s3260_s29] sm:$0xff]  }
 0x2cd   : > { %v1389_v50 = vpop.f32.mrf.mxu1  ;;  %v1984_v48 = vld [vmem:[%s3626_s20] sm:$0x1]  ;;  %s3635_s20 = scalar_lea.vmem %s3634_s16, %s3217_s26 }
 0x2ce   : > { %v1396_v51 = vmul.f32 0.25, %v1389_v50  ;;  %v1408_v52 = vsel %vm1401_vm5, %v1399_v49, -inf }
 0x2cf   : > { %1409 = vmax.xlane.f32.xlu0 %v1408_v52  ;;  %v2821_v53 = vpop.f32.mrf.mxu1 }
 0x2d0   : > { %v1400_v54 = vadd.f32 %v1396_v51, %v956_v36  ;;  %v2985_v36 = vld [vmem:[%s3624_s30 + $0x18] sm:$0xff]  }
 0x2d2   : > { %v1411_v55 = vsel %vm1401_vm5, %v1400_v54, -inf }
 0x2d3   : > { %1412 = vmax.xlane.f32.xlu1 %v1411_v55 }
 0x2e4   : > { %v1404_v56 = vpop.xlane.xlu1 %1403 }
 0x2e5   : > { %v1414_v57 = vsub.f32 %v1397_v39, %v1404_v56 }
 0x2e7   : > { %v1418_v58 = vmul.f32 1.442695, %v1414_v57  ;;  %v2990_v57 = vld [vmem:[%s3269_s1 + $0x18] sm:$0xff]  }
 0x2e9   : > { %3006 = vpow2.f32 %v1418_v58  ;;  %v2991_v58 = vld [vmem:[%s3269_s1 + $0x10] sm:$0xff]  }
 0x2f6   : > { %v3007_v59 = vpop.eup %3006 }
 0x2f7   : > { %v1426_v60 = vsel %vm1401_vm5, %v3007_v59, 0.0 }
 0x2f8   : > { %1427 = vadd.xlane.f32.xlu0 %v1426_v60  ;;  %v2993_v60 = vld [vmem:[%s3269_s1] sm:$0xff]  }
 0x353   : > { %v1407_v61 = vpop.xlane.xlu0 %1406 }
 0x354   : > { %v1415_v62 = vsub.f32 %v1398_v44, %v1407_v61 }
 0x356   : > { %v1420_v63 = vmul.f32 1.442695, %v1415_v62 }
 0x358   : > { %3008 = vpow2.f32 %v1420_v63  ;;  %v1410_v0 = vpop.xlane.xlu0 %1409 }
 0x359   : > { %v1416_v1 = vsub.f32 %v1399_v49, %v1410_v0  ;;  %v1994_v49 = vpack.c.bf16 %v1984_v48, %v1984_v48 }
 0x35b   : > { %v1422_v2 = vmul.f32 1.442695, %v1416_v1 }
 0x35c   : > { %v1413_v7 = vpop.xlane.xlu1 %1412 }
 0x35d   : > { %3010 = vpow2.f32 %v1422_v2  ;;  %v1417_v9 = vsub.f32 %v1400_v54, %v1413_v7 }
 0x35f   : > { %v1424_v11 = vmul.f32 1.442695, %v1417_v9 }
 0x365   : > { %v3009_v3 = vpop.eup %3008 }
 0x366   : > { %v1429_v4 = vsel %vm1401_vm5, %v3009_v3, 0.0 }
 0x367   : > { %1430 = vadd.xlane.f32.xlu1 %v1429_v4 }
 0x36a   : > { %v3011_v5 = vpop.eup %3010 }
 0x36b   : > { %v1432_v6 = vsel %vm1401_vm5, %v3011_v5, 0.0 }
 0x36c   : > { %1433 = vadd.xlane.f32.xlu0 %v1432_v6 }
 0x378   : > { %1079 = vrot.lane.b32.xlu1 %v1059_v32, %s3072_s3 }
 0x381   : > { %v1428_v8 = vpop.xlane.xlu0 %1427 }
 0x382   : > { %1082 = vrot.lane.b32.xlu0 %v1059_v32, %s3074_s21  ;;  %3012 = vrcp.f32 %v1428_v8  ;;  %s3632_s21 = sld [smem:[#allocation18_spill]] }
 0x383   : > { %3014 = vpow2.f32 %v1424_v11 }
 0x386   : > { %1085 = vrot.lane.b32.xlu0 %v1059_v32, %s3071_s25  ;;  %s3631_s25 = sld [smem:[#allocation12_spill]] }
 0x388   : > { %s3633_s30 = scalar_lea.vmem %s3632_s21, %s3217_s26  ;;  %s3643_s21 = sld [smem:[#allocation3_spill]] }
 0x38c   : > { %v2994_v13 = vld [vmem:[%s3631_s25 + $0x18] sm:$0xff]  }
 0x38e   : > { %p2745_p8 = scmp.ne.s32.totalorder %s3643_s21, 1 }
 0x38f   : > { %v3013_v12 = vpop.eup %3012 }
 0x390   : > { %v1439_v16 = vmul.f32 %v3013_v12, %v3007_v59  ;;  %v3015_v17 = vpop.eup %3014  ;;  %v2992_v59 = vld [vmem:[%s3269_s1 + $0x8] sm:$0xff]  }
 0x391   : > { %v1435_v18 = vsel %vm1401_vm5, %v3015_v17, 0.0 }
 0x392   : > { %2825 = vmatmul.mubr.msk.f32.vlgmr.msra.gmra.mxu1 %vm1401_vm5, %v1439_v16 }
 0x393   : > { %2834 = vmatprep.mubr.msk.f32.mxu1 %vm3070_vm2, %v3069_v14 }
 0x39c   : > { %1436 = vadd.xlane.f32.xlu1 %v1435_v18 }
 0x3f0   : > { %v1431_v19 = vpop.xlane.xlu1 %1430 }
 0x3f1   : > { %3016 = vrcp.f32 %v1431_v19 }
 0x3f4   : > { %v1080_v20 = vpop.permute.xlu1 %1079 }
 0x3f5   : > { %v1434_v21 = vpop.xlane.xlu0 %1433  ;;  %2828 = vmatpush3.msra.mxu0 %v1080_v20 }
 0x3f6   : > { %3018 = vrcp.f32 %v1434_v21  ;;  %2837 = vmatprep.subr.mxu0 %v3069_v14 }
 0x3f9   : > { %v1083_v22 = vpop.permute.xlu0 %1082 }
 0x3fa   : > { %2833 = vmatpush3.msra.mxu1 %v1083_v22 }
 0x3fb   : > { %2842 = vmatprep.subr.bf16.mxu1 %v3069_v14 }
 0x3fd   : > { %v1086_v25 = vpop.permute.xlu0 %1085 }
 0x3fe   : > { %v3017_v23 = vpop.eup %3016 }
 0x3ff   : > { %v1441_v24 = vmul.f32 %v3017_v23, %v3009_v3  ;;  %v2713_v23 = vld [vmem:[%s3628_s4] ss:$0 sm:$0xff] }
 0x401   : > { %2830 = vmatmul.mubr.msk.f32.vlgmr.msra.gmra.mxu0 %vm1401_vm5, %v1441_v24 }
 0x402   : > { %2838 = vmatpush3.msra.mxu0 %v1086_v25  ;;  %2839 = vmatprep.mubr.msk.f32.mxu0 %vm3070_vm2, %v3069_v14 }
 0x403   : > { %v3019_v26 = vpop.eup %3018  ;;  %2860 = vmatprep.subr.bf16.mxu0 %v3069_v14 }
 0x404   : > { %v1443_v28 = vmul.f32 %v3019_v26, %v3011_v5  ;;  %v1993_v5 = vld [vmem:[%s3627_s28] sm:$0x1]  ;;  %s3636_s28 = sld [smem:[#allocation22_spill]] }
 0x406   : > { %2835 = vmatmul.mubr.msk.f32.vlgmr.msra.gmra.mxu1 %vm1401_vm5, %v1443_v28 }
 0x407   : > { %2843 = vmatpush3.bf16.msra.mxu1 %v2982_v27  ;;  %2844 = vmatprep.mubr.msk.bf16.mxu1 %vm3070_vm2, %v3069_v14 }
 0x408   : > { %2848 = vmatprep.subr.bf16.mxu1 %v3069_v14 }
 0x40a   : > { %s3637_s1 = scalar_lea.vmem %s3636_s28, %s3217_s26 }
 0x425   : > { %v1437_v29 = vpop.xlane.xlu1 %1436 }
 0x426   : > { %3020 = vrcp.f32 %v1437_v29 }
 0x433   : > { %v3021_v30 = vpop.eup %3020 }
 0x434   : > { %v1445_v31 = vmul.f32 %v3021_v30, %v3015_v17 }
 0x436   : > { %2840 = vmatmul.mubr.msk.f32.vlgmr.msra.gmra.mxu0 %vm1401_vm5, %v1445_v31 }
 0x437   : > { %2862 = vmatprep.mubr.msk.bf16.mxu0 %vm3070_vm2, %v3069_v14  ;;  %2861 = vmatpush3.bf16.msra.mxu0 %v2985_v36 }
 0x438   : > { %2878 = vmatprep.subr.bf16.mxu0 %v3069_v14 }
 0x452   : > { %v1515_v32 = vpop.f32.mrf.mxu1 }
 0x453   : > { %v1738_v34 = vpack.c.bf16 %v1515_v32, %v1515_v32 }
 0x454   : > { %v2826_v35 = vpop.f32.mrf.mxu1 }
 0x455   : > { %2845 = vmatmul.mubr.msk.bf16.vlgmr.msra.gmra.mxu1 %vm1090_vm3, %v1738_v34 }
 0x456   : > { %2849 = vmatpush3.bf16.msra.mxu1 %v2983_v33  ;;  %2850 = vmatprep.mubr.msk.bf16.mxu1 %vm3070_vm2, %v3069_v14 }
 0x457   : > { %2854 = vmatprep.subr.bf16.mxu1 %v3069_v14 }
 0x4c1   : > { %v1588_v37 = vpop.f32.mrf.mxu0 }
 0x4c2   : > { %v1739_v39 = vpack.c.bf16 %v1588_v37, %v1588_v37 }
 0x4c3   : > { %v2831_v40 = vpop.f32.mrf.mxu0 }
 0x4c4   : > { %2851 = vmatmul.mubr.msk.bf16.vlgmr.msra.gmra.mxu1 %vm1090_vm3, %v1739_v39 }
 0x4c5   : > { %2855 = vmatpush3.bf16.msra.mxu1 %v2984_v38  ;;  %2856 = vmatprep.mubr.msk.bf16.mxu1 %vm3070_vm2, %v3069_v14 }
 0x4c6   : > { %v1661_v41 = vpop.f32.mrf.mxu1  ;;  %2866 = vmatprep.subr.bf16.mxu1 %v3069_v14 }
 0x4c7   : > { %v1740_v44 = vpack.c.bf16 %v1661_v41, %v1661_v41 }
 0x4c8   : > { %v2836_v42 = vpop.f32.mrf.mxu1 }
 0x4c9   : > { %v2070_v42 = vld [vmem:[%s3629_s23] sm:$0x1] }
 0x4cc   : > { %2857 = vmatmul.mubr.msk.bf16.vlgmr.msra.gmra.mxu1 %vm1090_vm3, %v1740_v44 }
 0x4cd   : > { %2867 = vmatpush3.bf16.msra.mxu1 %v2986_v43  ;;  %2874 = vmatprep.mubr.msk.bf16.mxu1 %vm3070_vm2, %v3069_v14 }
 0x4ce   : > { %2868 = vmatprep.subr.bf16.mxu1 %v3069_v14 }
 0x4d1   : > { %2869 = vmatpush3.bf16.msra.mxu1 %v2987_v45  ;;  %v2714_v45 = vld [vmem:[%s3630_s8] ss:$0 sm:$0xff] }
 0x4d2   : > { %2870 = vmatprep.subr.bf16.mxu1 %v3069_v14 }
 0x4d5   : > { %2871 = vmatpush3.bf16.msra.mxu1 %v2988_v46 }
 0x4d6   : > { %2872 = vmatprep.subr.bf16.mxu1 %v3069_v14 }
 0x4d9   : > { %2873 = vmatpush3.bf16.msra.mxu1 %v2989_v47  ;;  %v2715_v47 = vld [vmem:[%s3633_s30] ss:$0 sm:$0xff] }
 0x4da   : > { %2890 = vmatprep.subr.bf16.mxu1 %v3069_v14 }
 0x4dc   : > { %2875 = vmatmul.mubr.msk.bf16.vlgmr.msra.gmra.mxu1 %vm1018_vm1, %v1994_v49 }
 0x4dd   : > { %2898 = vmatprep.mubr.msk.bf16.mxu1 %vm3070_vm2, %v3069_v14  ;;  %2891 = vmatpush3.bf16.msra.mxu1 %v2994_v13 }
 0x4de   : > { %2892 = vmatprep.subr.bf16.mxu1 %v3069_v14 }
 0x4f6   : > { %v1734_v50 = vpop.f32.mrf.mxu0 }
 0x4f7   : > { %v1741_v51 = vpack.c.bf16 %v1734_v50, %v1734_v50 }
 0x4f8   : > { %v2841_v52 = vpop.f32.mrf.mxu0 }
 0x4f9   : > { %2863 = vmatmul.mubr.msk.bf16.vlgmr.msra.gmra.mxu0 %vm1090_vm3, %v1741_v51 }
 0x4fa   : > { %2886 = vmatprep.mubr.msk.bf16.mxu0 %vm3070_vm2, %v3069_v14  ;;  %2879 = vmatpush3.bf16.msra.mxu0 %v2990_v57 }
 0x4fb   : > { %2880 = vmatprep.subr.bf16.mxu0 %v3069_v14 }
 0x4fe   : > { %2881 = vmatpush3.bf16.msra.mxu0 %v2991_v58  ;;  %v2996_v58 = vld [vmem:[%s3631_s25 + $0x8] sm:$0xff]  }
 0x4ff   : > { %2882 = vmatprep.subr.bf16.mxu0 %v3069_v14 }
 0x502   : > { %2883 = vmatpush3.bf16.msra.mxu0 %v2992_v59  ;;  %v2997_v59 = vld [vmem:[%s3631_s25] sm:$0xff]  }
 0x503   : > { %2884 = vmatprep.subr.bf16.mxu0 %v3069_v14 }
 0x506   : > { %2885 = vmatpush3.bf16.msra.mxu0 %v2993_v60  ;;  %v2998_v60 = vld [vmem:[%s3295_s17 + $0x38] sm:$0xff]  }
 0x507   : > { %2902 = vmatprep.subr.bf16.mxu0 %v3069_v14 }
 0x515   : > { %v1785_v53 = vpop.f32.mrf.mxu1 }
 0x516   : > { %v1938_v17 = vsel %vm1018_vm1, %v1785_v53, 0.0 }
 0x517   : > { %v2846_v54 = vpop.f32.mrf.mxu1 }
 0x519   : > { %v1788_v55 = vpop.f32.mrf.mxu1 }
 0x51b   : > { %v2847_v56 = vpop.f32.mrf.mxu1 }
 0x584   : > { %v1834_v61 = vpop.f32.mrf.mxu1 }
 0x585   : > { %v1939_v16 = vsel %vm1018_vm1, %v1834_v61, 0.0  ;;  %v2999_v61 = vld [vmem:[%s3295_s17 + $0x30] sm:$0xff]  }
 0x586   : > { %v2852_v62 = vpop.f32.mrf.mxu1  ;;  %v1940_v19 = vadd.f32 %v1939_v16, %v1938_v17  ;;  %v3004_v16 = vld [vmem:[%s3295_s17 + $0x8] sm:$0xff]   ;;  %v3005_v17 = vld [vmem:[%s3295_s17] sm:$0xff]  }
 0x587   : > { %v3000_v62 = vld [vmem:[%s3295_s17 + $0x28] sm:$0xff]  }
 0x588   : > { %v1837_v63 = vpop.f32.mrf.mxu1 }
 0x589   : > { %v3001_v63 = vld [vmem:[%s3295_s17 + $0x20] sm:$0xff]  }
 0x58a   : > { %v2853_v0 = vpop.f32.mrf.mxu1 }
 0x58b   : > { %v3002_v0 = vld [vmem:[%s3295_s17 + $0x18] sm:$0xff]  }
 0x58c   : > { %v1883_v1 = vpop.f32.mrf.mxu1 }
 0x58d   : > { %v1941_v18 = vsel %vm1018_vm1, %v1883_v1, 0.0  ;;  %v3003_v1 = vld [vmem:[%s3295_s17 + $0x10] sm:$0xff]  }
 0x58e   : > { %v2858_v2 = vpop.f32.mrf.mxu1  ;;  %v1942_v20 = vadd.f32 %v1941_v18, %v1940_v19  ;;  %v2728_v18 = vld [vmem:[%s3639_s27] ss:$0 sm:$0xff] }
 0x590   : > { %v1886_v3 = vpop.f32.mrf.mxu1 }
 0x592   : > { %v2859_v4 = vpop.f32.mrf.mxu1 }
 0x59c   : > { %v2056_v6 = vpop.f32.mrf.mxu1 }
 0x59d   : > { %v2057_v7 = vadd.f32 %v2056_v6, %v1993_v5  ;;  %v2726_v6 = vld [vmem:[%s3635_s20] ss:$0 sm:$0xff] }
 0x59e   : > { %v2876_v8 = vpop.f32.mrf.mxu1 }
 0x59f   : > { %v2071_v9 = vpack.c.bf16 %v2057_v7, %v2057_v7  ;;  %v2727_v8 = vld [vmem:[%s3637_s1] ss:$0 sm:$0xff] }
 0x5a0   : > { %v2059_v11 = vpop.f32.mrf.mxu1 }
 0x5a1   : > { %2887 = vmatmul.mubr.msk.bf16.vlgmr.msra.gmra.mxu0 %vm1018_vm1, %v2071_v9 }
 0x5a2   : > { %v2877_v12 = vpop.f32.mrf.mxu1  ;;  %2918 = vmatprep.mubr.msk.bf16.mxu0 %vm3070_vm2, %v3069_v14  ;;  %2903 = vmatpush3.bf16.msra.mxu0 %v2998_v60 }
 0x5a3   : > { %2904 = vmatprep.subr.bf16.mxu0 %v3069_v14 }
 0x5a6   : > { %2905 = vmatpush3.bf16.msra.mxu0 %v2999_v61 }
 0x5a7   : > { %2906 = vmatprep.subr.bf16.mxu0 %v3069_v14 }
 0x5aa   : > { %2907 = vmatpush3.bf16.msra.mxu0 %v3000_v62 }
 0x5ab   : > { %2908 = vmatprep.subr.bf16.mxu0 %v3069_v14 }
 0x5ae   : > { %2909 = vmatpush3.bf16.msra.mxu0 %v3001_v63 }
 0x5af   : > { %2910 = vmatprep.subr.bf16.mxu0 %v3069_v14 }
 0x5b2   : > { %2911 = vmatpush3.bf16.msra.mxu0 %v3002_v0 }
 0x5b3   : > { %2912 = vmatprep.subr.bf16.mxu0 %v3069_v14 }
 0x5b6   : > { %2913 = vmatpush3.bf16.msra.mxu0 %v3003_v1 }
 0x5b7   : > { %2914 = vmatprep.subr.bf16.mxu0 %v3069_v14 }
 0x5b9   : > { %v1932_v21 = vpop.f32.mrf.mxu0 }
 0x5ba   : > { %v1943_v22 = vsel %vm1018_vm1, %v1932_v21, 0.0  ;;  %2915 = vmatpush3.bf16.msra.mxu0 %v3004_v16 }
 0x5bb   : > { %v1944_v24 = vadd.f32 %v1943_v22, %v1942_v20  ;;  %v2864_v25 = vpop.f32.mrf.mxu0  ;;  %2916 = vmatprep.subr.bf16.mxu0 %v3069_v14 }
 0x5bd   : > { %v1952_v26 = vadd.f32 %v2713_v23, %v1944_v24  ;;  %v1935_v27 = vpop.f32.mrf.mxu0 }
 0x5be   : > { %2917 = vmatpush3.bf16.msra.mxu0 %v3005_v17 }
 0x5bf   : > { %v2865_v28 = vpop.f32.mrf.mxu0  ;;  %v1953_v29 = vadd.f32 %v1952_v26, %v3324_v10 }
 0x5c1   : > { %v1956_v30 = vsel %vm1018_vm1, %v1953_v29, 0.0 }
 0x5c2   : > { %1957 = vadd.xlane.f32.xlu0 %v1956_v30 }
 0x64b   : > { %v1958_v31 = vpop.xlane.xlu0 %1957 }
 0x64c   : > { %v1960_v32 = vmul.f32 0.015625, %v1958_v31 }
 0x64e   : > { %v1961_v33 = vsub.f32 %v1953_v29, %v1960_v32 }
 0x650   : > { %v1962_v34 = vmul.f32 %v1961_v33, %v1961_v33 }
 0x652   : > { %v1963_v35 = vsel %vm1018_vm1, %v1962_v34, 0.0 }
 0x653   : > { %1964 = vadd.xlane.f32.xlu1 %v1963_v35 }
 0x661   : > { %v2133_v36 = vpop.f32.mrf.mxu0 }
 0x662   : > { %v2134_v43 = vadd.f32 %v2133_v36, %v2070_v42 }
 0x663   : > { %v2888_v37 = vpop.f32.mrf.mxu0 }
 0x664   : > { %v2142_v48 = vrot.slane %v2134_v43, %v970_v15  ;;  %v2995_v15 = vld [vmem:[%s3631_s25 + $0x10] sm:$0xff]   ;;  %v2744_v43 = vld [vmem:[%s937_s14] ss:$0 sm:$0xff] }
 0x665   : > { %v2136_v38 = vpop.f32.mrf.mxu0  ;;  %2893 = vmatpush3.bf16.msra.mxu1 %v2995_v15 }
 0x666   : > { %2894 = vmatprep.subr.bf16.mxu1 %v3069_v14 }
 0x667   : > { %v2889_v39 = vpop.f32.mrf.mxu0 }
 0x669   : > { %2895 = vmatpush3.bf16.msra.mxu1 %v2996_v58 }
 0x66a   : > { %2896 = vmatprep.subr.bf16.mxu1 %v3069_v14  ;;  %v2734_v14 = vld [vmem:[%s931_s12] ss:$0 sm:$0xff] }
 0x66d   : > { %2897 = vmatpush3.bf16.msra.mxu1 %v2997_v59 }
 0x6dc   : > { %v1965_v40 = vpop.xlane.xlu1 %1964 }
 0x6dd   : > { %v1966_v41 = vmul.f32 0.015625, %v1965_v40 }
 0x6df   : > { %v1967_v10 = vadd.f32 1e-05, %v1966_v41 }
 0x6e1   : > { %3022 = vrsqrt.f32 %v1967_v10  ;;  %v2743_v10 = vld [vmem:[%s934_s13] ss:$0 sm:$0xff] }
 0x6ee   : > { %v3023_v44 = vpop.eup %3022 }
 0x6ef   : > { %v1969_v46 = vmul.f32 %v3023_v44, %v1961_v33 }
 0x6f1   : > { %v1976_v49 = vmul.f32 %v2714_v45, %v1969_v46 }
 0x6f3   : > { %v1983_v50 = vadd.f32 %v2715_v47, %v1976_v49 }
 0x6f5   : > { %v2143_v51 = vadd.f32 %v2142_v48, %v1983_v50 }
 0x6f7   : > { %v2146_v52 = vsel %vm1018_vm1, %v2143_v51, 0.0 }
 0x6f8   : > { %2147 = vadd.xlane.f32.xlu1 %v2146_v52 }
 0x781   : > { %v2148_v53 = vpop.xlane.xlu1 %2147 }
 0x782   : > { %v2149_v54 = vmul.f32 0.015625, %v2148_v53 }
 0x784   : > { %v2150_v55 = vsub.f32 %v2143_v51, %v2149_v54 }
 0x786   : > { %v2151_v56 = vmul.f32 %v2150_v55, %v2150_v55 }
 0x788   : > { %v2152_v57 = vsel %vm1018_vm1, %v2151_v56, 0.0 }
 0x789   : > { %2153 = vadd.xlane.f32.xlu0 %v2152_v57 }
 0x812   : > { %v2154_v2 = vpop.xlane.xlu0 %2153 }
 0x813   : > { %v2155_v3 = vmul.f32 0.015625, %v2154_v2 }
 0x815   : > { %v2156_v4 = vadd.f32 1e-05, %v2155_v3 }
 0x817   : > { %3024 = vrsqrt.f32 %v2156_v4 }
 0x824   : > { %v3025_v5 = vpop.eup %3024 }
 0x825   : > { %v2158_v7 = vmul.f32 %v3025_v5, %v2150_v55 }
 0x827   : > { %v2165_v9 = vmul.f32 %v2726_v6, %v2158_v7 }
 0x829   : > { %v2172_v11 = vadd.f32 %v2727_v8, %v2165_v9 }
 0x82b   : > { %v2182_v12 = vpack.c.bf16 %v2172_v11, %v2172_v11 }
 0x82d   : > { %2899 = vmatmul.mubr.msk.bf16.vlgmr.msra.gmra.mxu1 %vm1018_vm1, %v2182_v12 }
 0x8ed   : > { %v2250_v19 = vpop.f32.mrf.mxu1 }
 0x8ee   : > { %v2251_v20 = vadd.f32 %v2728_v18, %v2250_v19 }
 0x8ef   : > { %v2900_v21 = vpop.f32.mrf.mxu1 }
 0x8f0   : > { %v2256_v22 = vmax.f32 %v2251_v20, 0.0 }
 0x8f1   : > { %v2253_v23 = vpop.f32.mrf.mxu1 }
 0x8f2   : > { %v2274_v24 = vpack.c.bf16 %v2256_v22, %v2256_v22 }
 0x8f3   : > { %v2901_v25 = vpop.f32.mrf.mxu1 }
 0x8f4   : > { %2919 = vmatmul.mubr.bf16.vlgmr.msra.gmra.mxu0 %v2274_v24 }
 0x9b4   : > { %v2363_v26 = vpop.f32.mrf.mxu0 }
 0x9b5   : > { %v2364_v27 = vadd.f32 %v2734_v14, %v2363_v26 }
 0x9b6   : > { %v2920_v28 = vpop.f32.mrf.mxu0 }
 0x9b7   : > { %v2369_v29 = vadd.f32 %v2364_v27, %v2172_v11 }
 0x9b8   : > { %v2366_v30 = vpop.f32.mrf.mxu0 }
 0x9b9   : > { %v2372_v31 = vsel %vm1018_vm1, %v2369_v29, 0.0 }
 0x9ba   : > { %2373 = vadd.xlane.f32.xlu1 %v2372_v31  ;;  %v2921_v32 = vpop.f32.mrf.mxu0 }
 0xa43   : > { %v2374_v33 = vpop.xlane.xlu1 %2373 }
 0xa44   : > { %v2375_v34 = vmul.f32 0.015625, %v2374_v33 }
 0xa46   : > { %v2376_v35 = vsub.f32 %v2369_v29, %v2375_v34 }
 0xa48   : > { %v2377_v36 = vmul.f32 %v2376_v35, %v2376_v35 }
 0xa4a   : > { %v2378_v37 = vsel %vm1018_vm1, %v2377_v36, 0.0 }
 0xa4b   : > { %2379 = vadd.xlane.f32.xlu0 %v2378_v37 }
 0xad4   : > { %v2380_v38 = vpop.xlane.xlu0 %2379 }
 0xad5   : > { %v2381_v39 = vmul.f32 0.015625, %v2380_v38 }
 0xad7   : > { %v2382_v40 = vadd.f32 1e-05, %v2381_v39 }
 0xad9   : > { %3026 = vrsqrt.f32 %v2382_v40 }
 0xae6   : > { %v3027_v41 = vpop.eup %3026 }
 0xae7   : > { %v2384_v42 = vmul.f32 %v3027_v41, %v2376_v35 }
 0xae9   : > { %v2391_v44 = vmul.f32 %v2743_v10, %v2384_v42  ;;  %2403 = sbr.rel (%p2745_p8) target bundleno = 2801 (0xaf1), region = 108 }
 0xaeb   : > { %v2398_v45 = vadd.f32 %v2744_v43, %v2391_v44 }
 0xaed   : > { %2399 = vst.msk [vmem:[#allocation2] sm:$0xff] %vm1018_vm1, %v2398_v45 }
 0xaee   : > { %v2404_v46 = vpack.c.bf16 %v2398_v45, %v2398_v45  ;;  %vm2405_vm6 = vcmask 519168  }
 0xaf0   : > { %2406 = vst.msk [vmem:[%s3313_s15] sm:$0xf] %vm2405_vm6, %v2404_v46 }
 0xaf1 PF: > { %s3644_s13 = sld [smem:[#allocation6_spill]] }
 0xaf2   : > { %s3645_s1 = sld [smem:[#allocation4_spill]] }
 0xaf3   : > { %s3646_s22 = sld [smem:[#allocation5_spill]] }
 0xaf4   : > { %s3647_s23 = sld [smem:[#allocation7_spill]] }
 0xaf5   : > { %s3648_s24 = sld [smem:[#allocation8_spill]] }
 0xaf7   : > { %s30_s2 = sadd.s32 1, %s3644_s13  }
 0xaf8   : > { %p27_p9 = scmp.ge.s32.totalorder %s30_s2, 6  }
 0xafa   :  { %29 = sbr.rel (!%p27_p9) target bundleno = 18 (0x12), region = 195 }

</bundles_post_ra>
